<compile_context>
chip_gen: v7x
topology: tpu7x:2x2x1
jax: 0.10.0
libtpu: 0.0.40
codegen_flags: <defaults>
</compile_context>

<pallas_src>
import functools

import jax
import jax.numpy as jnp
from jax.experimental import pallas as pl
from jax.experimental.pallas import tpu as pltpu


def _layer_norm(x, g, b, eps=1e-5):
    mu = jnp.mean(x, axis=-1, keepdims=True)
    var = jnp.mean((x - mu) ** 2, axis=-1, keepdims=True)
    return (x - mu) * jax.lax.rsqrt(var + eps) * g + b


def fused_kernel(
    xcol1_ref, wc1_ref, bc1_ref, wc2_ref, bc2_ref,
    wq_ref, bq_ref, wk_ref, bk_ref, wv_ref, bv_ref, wo_ref, bo_ref,
    g1_ref, be1_ref, w1_ref, b1_ref, w2_ref, b2_ref, g2_ref, be2_ref,
    wfc_ref, bfc_ref,
    o_ref,
    a1_ref, a2_ref,
    *, B, L, H):
    C1 = wc1_ref.shape[1]          # 128
    D = wc2_ref.shape[1]           # 32 (= d_model)
    hd = wq_ref.shape[2]           # 16
    L1 = L // 2
    S = L1 // 2                    # transformer sequence length per batch elem
    scale = 1.0 / (hd ** 0.5)

    # ---- Conv1 (single im2col matmul, bf16 x bf16 -> f32) + bias + ReLU ----
    a1 = jnp.dot(xcol1_ref[...], wc1_ref[...],
                 preferred_element_type=jnp.float32) + bc1_ref[...]   # (B*L, C1)
    a1_ref[...] = jnp.maximum(a1, 0.0)

    # ---- MaxPool1d(2): pairwise max of even/odd rows via strided loads ----
    # (L is even, so pooled pairs never cross a batch boundary.)
    p1 = jnp.maximum(a1_ref[pl.ds(0, B * L1, 2), :],
                     a1_ref[pl.ds(1, B * L1, 2), :])                  # (B*L1, C1)

    # ---- Conv2 im2col built in VMEM (zero pad each batch element's edges) ----
    p1b = p1.reshape(B, L1, C1)
    zrow = jnp.zeros((B, 1, C1), jnp.float32)
    left = jnp.concatenate([zrow, p1b[:, :L1 - 1, :]], axis=1)        # x[l-1]
    right = jnp.concatenate([p1b[:, 1:, :], zrow], axis=1)            # x[l+1]
    xcol2 = jnp.concatenate([left, p1b, right],
                            axis=-1).reshape(B * L1, 3 * C1)          # (B*L1, 3*C1)

    a2 = jnp.dot(xcol2.astype(jnp.bfloat16), wc2_ref[...],
                 preferred_element_type=jnp.float32) + bc2_ref[...]   # (B*L1, D)
    a2_ref[...] = jnp.maximum(a2, 0.0)
    x = jnp.maximum(a2_ref[pl.ds(0, B * S, 2), :],
                    a2_ref[pl.ds(1, B * S, 2), :])                    # (B*S, D) f32

    # ---- TransformerEncoderLayer (post-norm; eval-mode dropout = identity) ----
    x16 = x.astype(jnp.bfloat16)
    attn = None
    for h in range(H):   # H == 2; per-head weight slabs -> no lane slicing/concat
        qh = (jnp.dot(x16, wq_ref[h], preferred_element_type=jnp.float32)
              + bq_ref[h]).reshape(B, S, hd)
        kh = (jnp.dot(x16, wk_ref[h], preferred_element_type=jnp.float32)
              + bk_ref[h]).reshape(B, S, hd)
        vh = (jnp.dot(x16, wv_ref[h], preferred_element_type=jnp.float32)
              + bv_ref[h]).reshape(B, S, hd)
        s = jnp.einsum("bqd,bkd->bqk", qh, kh,
                       preferred_element_type=jnp.float32) * scale    # (B, S, S)
        s = s - jnp.max(s, axis=-1, keepdims=True)
        p = jnp.exp(s)
        p = p * pl.reciprocal(jnp.sum(p, axis=-1, keepdims=True), approx=True)
        ctx = jnp.einsum("bqk,bkd->bqd", p.astype(jnp.bfloat16),
                         vh.astype(jnp.bfloat16),
                         preferred_element_type=jnp.float32)          # (B, S, hd)
        # concat(heads) @ Wo  ==  sum_h  ctx_h @ Wo[h*hd:(h+1)*hd, :]
        contrib = jnp.dot(ctx.reshape(B * S, hd).astype(jnp.bfloat16),
                          wo_ref[h], preferred_element_type=jnp.float32)
        attn = contrib if attn is None else attn + contrib
    attn = attn + bo_ref[...]                                         # (B*S, D)

    x = _layer_norm(x + attn, g1_ref[...], be1_ref[...])

    # Feed-forward (bf16 operands, f32 accumulate)
    h1 = jnp.maximum(
        jnp.dot(x.astype(jnp.bfloat16), w1_ref[...],
                preferred_element_type=jnp.float32) + b1_ref[...], 0.0)
    ff = jnp.dot(h1.astype(jnp.bfloat16), w2_ref[...],
                 preferred_element_type=jnp.float32) + b2_ref[...]
    x = _layer_norm(x + ff, g2_ref[...], be2_ref[...])

    # ---- mean over sequence, then Linear (output lane-padded to 128) ----
    pooled = jnp.mean(x.reshape(B, S, D), axis=1)                     # (B, D)
    out = jnp.dot(pooled.astype(jnp.bfloat16), wfc_ref[...],
                  preferred_element_type=jnp.float32) + bfc_ref[...]  # (B, NCpad)
    o_ref[...] = out.astype(o_ref.dtype)


@functools.partial(jax.jit, static_argnames=("num_classes",))
def cnn_transformer_forward(x_ncw, params, num_classes=1):
    # x_ncw: (B, C_in, L) -- same convention as PyTorch Conv1d input.
    B, Cin, L = x_ncw.shape
    C1 = params["bc1"].shape[1]
    D = params["bc2"].shape[1]
    H = params["wq"].shape[0]
    ncp = params["wfc"].shape[1]

    # NCW -> NLC + k=3/pad=1 im2col for conv1 (tiny one-shot XLA glue feeding
    # the single fused kernel; all later activations stay in VMEM).
    x_nlc = jnp.transpose(x_ncw, (0, 2, 1))
    xp = jnp.pad(x_nlc, ((0, 0), (1, 1), (0, 0)))
    xcol1 = jnp.concatenate([xp[:, 0:L], xp[:, 1:L + 1], xp[:, 2:L + 2]],
                            axis=-1).reshape(B * L, 3 * Cin).astype(jnp.bfloat16)

    # TODO(synk): on v7x, shard the batch across the 2 TensorCores (pl.core_map
    # or a leading core grid axis); the single fused step is optimal for the
    # single-TensorCore v5e/v6e.
    out = pl.pallas_call(
        functools.partial(fused_kernel, B=B, L=L, H=H),
        out_shape=jax.ShapeDtypeStruct((B, ncp), jnp.float32),
        scratch_shapes=[
            pltpu.VMEM((B * L, C1), jnp.float32),        # conv1 pre-pool act
            pltpu.VMEM((B * (L // 2), D), jnp.float32),  # conv2 pre-pool act
        ],
    )(xcol1, params["wc1"], params["bc1"], params["wc2"], params["bc2"],
      params["wq"], params["bq"], params["wk"], params["bk"],
      params["wv"], params["bv"], params["wo"], params["bo"],
      params["g1"], params["be1"], params["w1"], params["b1"],
      params["w2"], params["b2"], params["g2"], params["be2"],
      params["wfc"], params["bfc"])
    return out[:, :num_classes]


if __name__ == "__main__":
    B, Cin, L = 2, 257, 16              # small shapes consistent with the module
    C1, D, F, NC, H = 128, 32, 2048, 1, 2
    hd = D // H
    ncp = -(-NC // 128) * 128           # lane-pad fc output to a multiple of 128
    bf16 = jnp.bfloat16

    key = jax.random.PRNGKey(0)
    ks = jax.random.split(key, 12)
    s = 0.02

    # Weights generated directly in "x @ W" layout; transpose PyTorch
    # checkpoints ((out,in) Linear, (Cout,Cin,K) Conv1d) when loading for real.
    w_c1 = jax.random.normal(ks[0], (3, Cin, C1), jnp.float32) * s   # [tap, Cin, Cout]
    b_c1 = jax.random.normal(ks[1], (C1,), jnp.float32) * s
    w_c2 = jax.random.normal(ks[2], (3, C1, D), jnp.float32) * s
    b_c2 = jax.random.normal(ks[3], (D,), jnp.float32) * s
    w_qkv = jax.random.normal(ks[4], (D, 3 * D), jnp.float32) * s
    b_qkv = jnp.zeros((3 * D,), jnp.float32)
    w_o = jax.random.normal(ks[5], (D, D), jnp.float32) * s
    b_o = jnp.zeros((D,), jnp.float32)
    w_1 = jax.random.normal(ks[6], (D, F), jnp.float32) * s
    b_1 = jnp.zeros((F,), jnp.float32)
    w_2 = jax.random.normal(ks[7], (F, D), jnp.float32) * s
    b_2 = jnp.zeros((D,), jnp.float32)
    w_fc = jax.random.normal(ks[8], (D, NC), jnp.float32) * s
    b_fc = jnp.zeros((NC,), jnp.float32)

    wq_f, wk_f, wv_f = w_qkv[:, :D], w_qkv[:, D:2 * D], w_qkv[:, 2 * D:]
    bq_f, bk_f, bv_f = b_qkv[:D], b_qkv[D:2 * D], b_qkv[2 * D:]

    def heads_w(w):   # (D, D) -> (H, D, hd): per-head projection slabs
        return jnp.transpose(w.reshape(D, H, hd), (1, 0, 2)).astype(bf16)

    def heads_b(b):   # (D,) -> (H, 1, hd)
        return b.reshape(H, 1, hd)

    params = dict(
        wc1=w_c1.reshape(3 * Cin, C1).astype(bf16),
        bc1=b_c1.reshape(1, C1),
        wc2=w_c2.reshape(3 * C1, D).astype(bf16),
        bc2=b_c2.reshape(1, D),
        wq=heads_w(wq_f), bq=heads_b(bq_f),
        wk=heads_w(wk_f), bk=heads_b(bk_f),
        wv=heads_w(wv_f), bv=heads_b(bv_f),
        wo=w_o.reshape(H, hd, D).astype(bf16),    # per-head rows of out-proj
        bo=b_o.reshape(1, D),
        g1=jnp.ones((1, D), jnp.float32), be1=jnp.zeros((1, D), jnp.float32),
        w1=w_1.astype(bf16), b1=b_1.reshape(1, F),
        w2=w_2.astype(bf16), b2=b_2.reshape(1, D),
        g2=jnp.ones((1, D), jnp.float32), be2=jnp.zeros((1, D), jnp.float32),
        wfc=jnp.pad(w_fc, ((0, 0), (0, ncp - NC))).astype(bf16),
        bfc=jnp.pad(b_fc.reshape(1, NC), ((0, 0), (0, ncp - NC))),
    )

    x = jax.random.normal(ks[9], (B, Cin, L), jnp.float32)

    out = cnn_transformer_forward(x, params, num_classes=NC)
    jax.block_until_ready(out)
    assert out.shape == (B, NC) and out.dtype == jnp.float32
    assert bool(jnp.all(jnp.isfinite(out)))
    print("KERNEL_OK")
</pallas_src>

<mosaic_0001>
module attributes {stable_mosaic.version = 11 : i64} {
  func.func @fused_kernel(%arg0: memref<32x771xbf16, #tpu.memory_space<vmem>>, %arg1: memref<771x128xbf16, #tpu.memory_space<vmem>>, %arg2: memref<1x128xf32, #tpu.memory_space<vmem>>, %arg3: memref<384x32xbf16, #tpu.memory_space<vmem>>, %arg4: memref<1x32xf32, #tpu.memory_space<vmem>>, %arg5: memref<2x32x16xbf16, #tpu.memory_space<vmem>>, %arg6: memref<2x1x16xf32, #tpu.memory_space<vmem>>, %arg7: memref<2x32x16xbf16, #tpu.memory_space<vmem>>, %arg8: memref<2x1x16xf32, #tpu.memory_space<vmem>>, %arg9: memref<2x32x16xbf16, #tpu.memory_space<vmem>>, %arg10: memref<2x1x16xf32, #tpu.memory_space<vmem>>, %arg11: memref<2x16x32xbf16, #tpu.memory_space<vmem>>, %arg12: memref<1x32xf32, #tpu.memory_space<vmem>>, %arg13: memref<1x32xf32, #tpu.memory_space<vmem>>, %arg14: memref<1x32xf32, #tpu.memory_space<vmem>>, %arg15: memref<32x2048xbf16, #tpu.memory_space<vmem>>, %arg16: memref<1x2048xf32, #tpu.memory_space<vmem>>, %arg17: memref<2048x32xbf16, #tpu.memory_space<vmem>>, %arg18: memref<1x32xf32, #tpu.memory_space<vmem>>, %arg19: memref<1x32xf32, #tpu.memory_space<vmem>>, %arg20: memref<1x32xf32, #tpu.memory_space<vmem>>, %arg21: memref<32x128xbf16, #tpu.memory_space<vmem>>, %arg22: memref<1x128xf32, #tpu.memory_space<vmem>>, %arg23: memref<2x128xf32, #tpu.memory_space<vmem>>, %arg24: memref<32x128xf32, #tpu.memory_space<vmem>>, %arg25: memref<16x32xf32, #tpu.memory_space<vmem>>) attributes {dimension_semantics = [], scalar_prefetch = 0 : i64, scratch_operands = 2 : i64, tpu.core_type = #tpu.core_type<tc>} {
    %c0 = arith.constant 0 : index
    %c0_0 = arith.constant 0 : index
    %0 = vector.load %arg0[%c0, %c0_0] : memref<32x771xbf16, #tpu.memory_space<vmem>>, vector<32x771xbf16>
    %c0_1 = arith.constant 0 : index
    %c0_2 = arith.constant 0 : index
    %1 = vector.load %arg1[%c0_1, %c0_2] : memref<771x128xbf16, #tpu.memory_space<vmem>>, vector<771x128xbf16>
    %cst = arith.constant dense<0.000000e+00> : vector<32x128xf32>
    %2 = tpu.matmul %0, %1, %cst {dimension_numbers = #tpu.dot_dimension_numbers<[1], [0], [0], [1], [0, 0, 1, 1], [], []>} : vector<32x771xbf16>, vector<771x128xbf16>, vector<32x128xf32> -> vector<32x128xf32>
    %c0_3 = arith.constant 0 : index
    %c0_4 = arith.constant 0 : index
    %3 = vector.load %arg2[%c0_3, %c0_4] : memref<1x128xf32, #tpu.memory_space<vmem>>, vector<1x128xf32>
    %4 = vector.broadcast %3 : vector<1x128xf32> to vector<32x128xf32>
    %5 = arith.addf %2, %4 : vector<32x128xf32>
    %cst_5 = arith.constant 0.000000e+00 : f32
    %6 = vector.broadcast %cst_5 : f32 to vector<32x128xf32>
    %7 = arith.maximumf %5, %6 : vector<32x128xf32>
    %c0_6 = arith.constant 0 : index
    %c0_7 = arith.constant 0 : index
    %8 = vector.load %arg24[%c0_6, %c0_7] : memref<32x128xf32, #tpu.memory_space<vmem>>, vector<32x128xf32>
    tpu.vector_store %arg24[%c0_6, %c0_7], %7 {strides = array<i32>} : memref<32x128xf32, #tpu.memory_space<vmem>>, vector<32x128xf32>,
    %c0_8 = arith.constant 0 : index
    %c0_9 = arith.constant 0 : index
    %9 = tpu.strided_load %arg24[%c0_8, %c0_9] {strides = array<i32: 2, 1>} : memref<32x128xf32, #tpu.memory_space<vmem>>, vector<16x128xf32>
    %c1 = arith.constant 1 : index
    %c0_10 = arith.constant 0 : index
    %10 = tpu.strided_load %arg24[%c1, %c0_10] {strides = array<i32: 2, 1>} : memref<32x128xf32, #tpu.memory_space<vmem>>, vector<16x128xf32>
    %11 = arith.maximumf %9, %10 : vector<16x128xf32>
    %12 = vector.shape_cast %11 : vector<16x128xf32> to vector<2x8x128xf32>
    %cst_11 = arith.constant 0.000000e+00 : f32
    %13 = vector.broadcast %cst_11 : f32 to vector<2x1x128xf32>
    %14 = vector.extract_strided_slice %12 {offsets = [0, 0, 0], sizes = [2, 7, 128], strides = [1, 1, 1]} : vector<2x8x128xf32> to vector<2x7x128xf32>
    %15 = tpu.concatenate %13, %14 in 1 : vector<2x1x128xf32>, vector<2x7x128xf32> -> vector<2x8x128xf32>
    %16 = vector.extract_strided_slice %12 {offsets = [0, 1, 0], sizes = [2, 7, 128], strides = [1, 1, 1]} : vector<2x8x128xf32> to vector<2x7x128xf32>
    %17 = tpu.concatenate %16, %13 in 1 : vector<2x7x128xf32>, vector<2x1x128xf32> -> vector<2x8x128xf32>
    %18 = tpu.concatenate %15, %12, %17 in 2 : vector<2x8x128xf32>, vector<2x8x128xf32>, vector<2x8x128xf32> -> vector<2x8x384xf32>
    %19 = vector.shape_cast %18 : vector<2x8x384xf32> to vector<16x384xf32>
    %20 = arith.truncf %19 : vector<16x384xf32> to vector<16x384xbf16>
    %c0_12 = arith.constant 0 : index
    %c0_13 = arith.constant 0 : index
    %21 = vector.load %arg3[%c0_12, %c0_13] : memref<384x32xbf16, #tpu.memory_space<vmem>>, vector<384x32xbf16>
    %cst_14 = arith.constant dense<0.000000e+00> : vector<16x32xf32>
    %22 = tpu.matmul %20, %21, %cst_14 {dimension_numbers = #tpu.dot_dimension_numbers<[1], [0], [0], [1], [0, 0, 1, 1], [], []>} : vector<16x384xbf16>, vector<384x32xbf16>, vector<16x32xf32> -> vector<16x32xf32>
    %c0_15 = arith.constant 0 : index
    %c0_16 = arith.constant 0 : index
    %23 = vector.load %arg4[%c0_15, %c0_16] : memref<1x32xf32, #tpu.memory_space<vmem>>, vector<1x32xf32>
    %24 = vector.broadcast %23 : vector<1x32xf32> to vector<16x32xf32>
    %25 = arith.addf %22, %24 : vector<16x32xf32>
    %cst_17 = arith.constant 0.000000e+00 : f32
    %26 = vector.broadcast %cst_17 : f32 to vector<16x32xf32>
    %27 = arith.maximumf %25, %26 : vector<16x32xf32>
    %c0_18 = arith.constant 0 : index
    %c0_19 = arith.constant 0 : index
    %28 = vector.load %arg25[%c0_18, %c0_19] : memref<16x32xf32, #tpu.memory_space<vmem>>, vector<16x32xf32>
    tpu.vector_store %arg25[%c0_18, %c0_19], %27 {strides = array<i32>} : memref<16x32xf32, #tpu.memory_space<vmem>>, vector<16x32xf32>,
    %c0_20 = arith.constant 0 : index
    %c0_21 = arith.constant 0 : index
    %29 = tpu.strided_load %arg25[%c0_20, %c0_21] {strides = array<i32: 2, 1>} : memref<16x32xf32, #tpu.memory_space<vmem>>, vector<8x32xf32>
    %c1_22 = arith.constant 1 : index
    %c0_23 = arith.constant 0 : index
    %30 = tpu.strided_load %arg25[%c1_22, %c0_23] {strides = array<i32: 2, 1>} : memref<16x32xf32, #tpu.memory_space<vmem>>, vector<8x32xf32>
    %31 = arith.maximumf %29, %30 : vector<8x32xf32>
    %32 = arith.truncf %31 : vector<8x32xf32> to vector<8x32xbf16>
    %c0_24 = arith.constant 0 : index
    %c0_25 = arith.constant 0 : index
    %c0_26 = arith.constant 0 : index
    %33 = vector.load %arg5[%c0_24, %c0_25, %c0_26] : memref<2x32x16xbf16, #tpu.memory_space<vmem>>, vector<1x32x16xbf16>
    %34 = vector.shape_cast %33 : vector<1x32x16xbf16> to vector<32x16xbf16>
    %cst_27 = arith.constant dense<0.000000e+00> : vector<8x16xf32>
    %35 = tpu.matmul %32, %34, %cst_27 {dimension_numbers = #tpu.dot_dimension_numbers<[1], [0], [0], [1], [0, 0, 1, 1], [], []>} : vector<8x32xbf16>, vector<32x16xbf16>, vector<8x16xf32> -> vector<8x16xf32>
    %c0_28 = arith.constant 0 : index
    %c0_29 = arith.constant 0 : index
    %c0_30 = arith.constant 0 : index
    %36 = vector.load %arg6[%c0_28, %c0_29, %c0_30] : memref<2x1x16xf32, #tpu.memory_space<vmem>>, vector<1x1x16xf32>
    %37 = vector.shape_cast %36 : vector<1x1x16xf32> to vector<1x16xf32>
    %38 = vector.broadcast %37 : vector<1x16xf32> to vector<8x16xf32>
    %39 = arith.addf %35, %38 : vector<8x16xf32>
    %40 = vector.shape_cast %39 : vector<8x16xf32> to vector<2x4x16xf32>
    %c0_31 = arith.constant 0 : index
    %c0_32 = arith.constant 0 : index
    %c0_33 = arith.constant 0 : index
    %41 = vector.load %arg7[%c0_31, %c0_32, %c0_33] : memref<2x32x16xbf16, #tpu.memory_space<vmem>>, vector<1x32x16xbf16>
    %42 = vector.shape_cast %41 : vector<1x32x16xbf16> to vector<32x16xbf16>
    %cst_34 = arith.constant dense<0.000000e+00> : vector<8x16xf32>
    %43 = tpu.matmul %32, %42, %cst_34 {dimension_numbers = #tpu.dot_dimension_numbers<[1], [0], [0], [1], [0, 0, 1, 1], [], []>} : vector<8x32xbf16>, vector<32x16xbf16>, vector<8x16xf32> -> vector<8x16xf32>
    %c0_35 = arith.constant 0 : index
    %c0_36 = arith.constant 0 : index
    %c0_37 = arith.constant 0 : index
    %44 = vector.load %arg8[%c0_35, %c0_36, %c0_37] : memref<2x1x16xf32, #tpu.memory_space<vmem>>, vector<1x1x16xf32>
    %45 = vector.shape_cast %44 : vector<1x1x16xf32> to vector<1x16xf32>
    %46 = vector.broadcast %45 : vector<1x16xf32> to vector<8x16xf32>
    %47 = arith.addf %43, %46 : vector<8x16xf32>
    %48 = vector.shape_cast %47 : vector<8x16xf32> to vector<2x4x16xf32>
    %c0_38 = arith.constant 0 : index
    %c0_39 = arith.constant 0 : index
    %c0_40 = arith.constant 0 : index
    %49 = vector.load %arg9[%c0_38, %c0_39, %c0_40] : memref<2x32x16xbf16, #tpu.memory_space<vmem>>, vector<1x32x16xbf16>
    %50 = vector.shape_cast %49 : vector<1x32x16xbf16> to vector<32x16xbf16>
    %cst_41 = arith.constant dense<0.000000e+00> : vector<8x16xf32>
    %51 = tpu.matmul %32, %50, %cst_41 {dimension_numbers = #tpu.dot_dimension_numbers<[1], [0], [0], [1], [0, 0, 1, 1], [], []>} : vector<8x32xbf16>, vector<32x16xbf16>, vector<8x16xf32> -> vector<8x16xf32>
    %c0_42 = arith.constant 0 : index
    %c0_43 = arith.constant 0 : index
    %c0_44 = arith.constant 0 : index
    %52 = vector.load %arg10[%c0_42, %c0_43, %c0_44] : memref<2x1x16xf32, #tpu.memory_space<vmem>>, vector<1x1x16xf32>
    %53 = vector.shape_cast %52 : vector<1x1x16xf32> to vector<1x16xf32>
    %54 = vector.broadcast %53 : vector<1x16xf32> to vector<8x16xf32>
    %55 = arith.addf %51, %54 : vector<8x16xf32>
    %56 = vector.shape_cast %55 : vector<8x16xf32> to vector<2x4x16xf32>
    "tpu.trace_start"() <{level = 10 : i32, message = "bqd,bkd->bqk"}> : () -> ()
    %cst_45 = arith.constant dense<0.000000e+00> : vector<2x4x4xf32>
    %57 = tpu.matmul %40, %48, %cst_45 {dimension_numbers = #tpu.dot_dimension_numbers<[2], [2], [1], [1], [0, 0, 0, 1, 1, 1], [0], [0]>} : vector<2x4x16xf32>, vector<2x4x16xf32>, vector<2x4x4xf32> -> vector<2x4x4xf32>
    "tpu.trace_stop"() : () -> ()
    %cst_46 = arith.constant 2.500000e-01 : f32
    %58 = vector.broadcast %cst_46 : f32 to vector<2x4x4xf32>
    %59 = arith.mulf %57, %58 : vector<2x4x4xf32>
    %cst_47 = arith.constant dense<0xFF800000> : vector<2x4xf32>
    %60 = vector.multi_reduction <maximumf>, %59, %cst_47 [2] : vector<2x4x4xf32> to vector<2x4xf32>
    %61 = vector.shape_cast %60 : vector<2x4xf32> to vector<2x4x1xf32>
    %62 = vector.broadcast %61 : vector<2x4x1xf32> to vector<2x4x4xf32>
    %63 = arith.subf %59, %62 : vector<2x4x4xf32>
    %64 = math.exp %63 : vector<2x4x4xf32>
    %cst_48 = arith.constant dense<0.000000e+00> : vector<2x4xf32>
    %65 = vector.multi_reduction <add>, %64, %cst_48 [2] : vector<2x4x4xf32> to vector<2x4xf32>
    %66 = vector.shape_cast %65 : vector<2x4xf32> to vector<2x4x1xf32>
    %67 = tpu.reciprocal %66 {approx = true} : vector<2x4x1xf32> -> vector<2x4x1xf32>
    %68 = vector.broadcast %67 : vector<2x4x1xf32> to vector<2x4x4xf32>
    %69 = arith.mulf %64, %68 : vector<2x4x4xf32>
    %70 = arith.truncf %69 : vector<2x4x4xf32> to vector<2x4x4xbf16>
    %71 = arith.truncf %56 : vector<2x4x16xf32> to vector<2x4x16xbf16>
    "tpu.trace_start"() <{level = 10 : i32, message = "bqk,bkd->bqd"}> : () -> ()
    %cst_49 = arith.constant dense<0.000000e+00> : vector<2x4x16xf32>
    %72 = tpu.matmul %70, %71, %cst_49 {dimension_numbers = #tpu.dot_dimension_numbers<[2], [1], [1], [2], [0, 0, 0, 1, 1, 2], [0], [0]>} : vector<2x4x4xbf16>, vector<2x4x16xbf16>, vector<2x4x16xf32> -> vector<2x4x16xf32>
    "tpu.trace_stop"() : () -> ()
    %73 = vector.shape_cast %72 : vector<2x4x16xf32> to vector<8x16xf32>
    %74 = arith.truncf %73 : vector<8x16xf32> to vector<8x16xbf16>
    %c0_50 = arith.constant 0 : index
    %c0_51 = arith.constant 0 : index
    %c0_52 = arith.constant 0 : index
    %75 = vector.load %arg11[%c0_50, %c0_51, %c0_52] : memref<2x16x32xbf16, #tpu.memory_space<vmem>>, vector<1x16x32xbf16>
    %76 = vector.shape_cast %75 : vector<1x16x32xbf16> to vector<16x32xbf16>
    %cst_53 = arith.constant dense<0.000000e+00> : vector<8x32xf32>
    %77 = tpu.matmul %74, %76, %cst_53 {dimension_numbers = #tpu.dot_dimension_numbers<[1], [0], [0], [1], [0, 0, 1, 1], [], []>} : vector<8x16xbf16>, vector<16x32xbf16>, vector<8x32xf32> -> vector<8x32xf32>
    %c1_54 = arith.constant 1 : index
    %c0_55 = arith.constant 0 : index
    %c0_56 = arith.constant 0 : index
    %78 = vector.load %arg5[%c1_54, %c0_55, %c0_56] : memref<2x32x16xbf16, #tpu.memory_space<vmem>>, vector<1x32x16xbf16>
    %79 = vector.shape_cast %78 : vector<1x32x16xbf16> to vector<32x16xbf16>
    %cst_57 = arith.constant dense<0.000000e+00> : vector<8x16xf32>
    %80 = tpu.matmul %32, %79, %cst_57 {dimension_numbers = #tpu.dot_dimension_numbers<[1], [0], [0], [1], [0, 0, 1, 1], [], []>} : vector<8x32xbf16>, vector<32x16xbf16>, vector<8x16xf32> -> vector<8x16xf32>
    %c1_58 = arith.constant 1 : index
    %c0_59 = arith.constant 0 : index
    %c0_60 = arith.constant 0 : index
    %81 = vector.load %arg6[%c1_58, %c0_59, %c0_60] : memref<2x1x16xf32, #tpu.memory_space<vmem>>, vector<1x1x16xf32>
    %82 = vector.shape_cast %81 : vector<1x1x16xf32> to vector<1x16xf32>
    %83 = vector.broadcast %82 : vector<1x16xf32> to vector<8x16xf32>
    %84 = arith.addf %80, %83 : vector<8x16xf32>
    %85 = vector.shape_cast %84 : vector<8x16xf32> to vector<2x4x16xf32>
    %c1_61 = arith.constant 1 : index
    %c0_62 = arith.constant 0 : index
    %c0_63 = arith.constant 0 : index
    %86 = vector.load %arg7[%c1_61, %c0_62, %c0_63] : memref<2x32x16xbf16, #tpu.memory_space<vmem>>, vector<1x32x16xbf16>
    %87 = vector.shape_cast %86 : vector<1x32x16xbf16> to vector<32x16xbf16>
    %cst_64 = arith.constant dense<0.000000e+00> : vector<8x16xf32>
    %88 = tpu.matmul %32, %87, %cst_64 {dimension_numbers = #tpu.dot_dimension_numbers<[1], [0], [0], [1], [0, 0, 1, 1], [], []>} : vector<8x32xbf16>, vector<32x16xbf16>, vector<8x16xf32> -> vector<8x16xf32>
    %c1_65 = arith.constant 1 : index
    %c0_66 = arith.constant 0 : index
    %c0_67 = arith.constant 0 : index
    %89 = vector.load %arg8[%c1_65, %c0_66, %c0_67] : memref<2x1x16xf32, #tpu.memory_space<vmem>>, vector<1x1x16xf32>
    %90 = vector.shape_cast %89 : vector<1x1x16xf32> to vector<1x16xf32>
    %91 = vector.broadcast %90 : vector<1x16xf32> to vector<8x16xf32>
    %92 = arith.addf %88, %91 : vector<8x16xf32>
    %93 = vector.shape_cast %92 : vector<8x16xf32> to vector<2x4x16xf32>
    %c1_68 = arith.constant 1 : index
    %c0_69 = arith.constant 0 : index
    %c0_70 = arith.constant 0 : index
    %94 = vector.load %arg9[%c1_68, %c0_69, %c0_70] : memref<2x32x16xbf16, #tpu.memory_space<vmem>>, vector<1x32x16xbf16>
    %95 = vector.shape_cast %94 : vector<1x32x16xbf16> to vector<32x16xbf16>
    %cst_71 = arith.constant dense<0.000000e+00> : vector<8x16xf32>
    %96 = tpu.matmul %32, %95, %cst_71 {dimension_numbers = #tpu.dot_dimension_numbers<[1], [0], [0], [1], [0, 0, 1, 1], [], []>} : vector<8x32xbf16>, vector<32x16xbf16>, vector<8x16xf32> -> vector<8x16xf32>
    %c1_72 = arith.constant 1 : index
    %c0_73 = arith.constant 0 : index
    %c0_74 = arith.constant 0 : index
    %97 = vector.load %arg10[%c1_72, %c0_73, %c0_74] : memref<2x1x16xf32, #tpu.memory_space<vmem>>, vector<1x1x16xf32>
    %98 = vector.shape_cast %97 : vector<1x1x16xf32> to vector<1x16xf32>
    %99 = vector.broadcast %98 : vector<1x16xf32> to vector<8x16xf32>
    %100 = arith.addf %96, %99 : vector<8x16xf32>
    %101 = vector.shape_cast %100 : vector<8x16xf32> to vector<2x4x16xf32>
    "tpu.trace_start"() <{level = 10 : i32, message = "bqd,bkd->bqk"}> : () -> ()
    %cst_75 = arith.constant dense<0.000000e+00> : vector<2x4x4xf32>
    %102 = tpu.matmul %85, %93, %cst_75 {dimension_numbers = #tpu.dot_dimension_numbers<[2], [2], [1], [1], [0, 0, 0, 1, 1, 1], [0], [0]>} : vector<2x4x16xf32>, vector<2x4x16xf32>, vector<2x4x4xf32> -> vector<2x4x4xf32>
    "tpu.trace_stop"() : () -> ()
    %cst_76 = arith.constant 2.500000e-01 : f32
    %103 = vector.broadcast %cst_76 : f32 to vector<2x4x4xf32>
    %104 = arith.mulf %102, %103 : vector<2x4x4xf32>
    %cst_77 = arith.constant dense<0xFF800000> : vector<2x4xf32>
    %105 = vector.multi_reduction <maximumf>, %104, %cst_77 [2] : vector<2x4x4xf32> to vector<2x4xf32>
    %106 = vector.shape_cast %105 : vector<2x4xf32> to vector<2x4x1xf32>
    %107 = vector.broadcast %106 : vector<2x4x1xf32> to vector<2x4x4xf32>
    %108 = arith.subf %104, %107 : vector<2x4x4xf32>
    %109 = math.exp %108 : vector<2x4x4xf32>
    %cst_78 = arith.constant dense<0.000000e+00> : vector<2x4xf32>
    %110 = vector.multi_reduction <add>, %109, %cst_78 [2] : vector<2x4x4xf32> to vector<2x4xf32>
    %111 = vector.shape_cast %110 : vector<2x4xf32> to vector<2x4x1xf32>
    %112 = tpu.reciprocal %111 {approx = true} : vector<2x4x1xf32> -> vector<2x4x1xf32>
    %113 = vector.broadcast %112 : vector<2x4x1xf32> to vector<2x4x4xf32>
    %114 = arith.mulf %109, %113 : vector<2x4x4xf32>
    %115 = arith.truncf %114 : vector<2x4x4xf32> to vector<2x4x4xbf16>
    %116 = arith.truncf %101 : vector<2x4x16xf32> to vector<2x4x16xbf16>
    "tpu.trace_start"() <{level = 10 : i32, message = "bqk,bkd->bqd"}> : () -> ()
    %cst_79 = arith.constant dense<0.000000e+00> : vector<2x4x16xf32>
    %117 = tpu.matmul %115, %116, %cst_79 {dimension_numbers = #tpu.dot_dimension_numbers<[2], [1], [1], [2], [0, 0, 0, 1, 1, 2], [0], [0]>} : vector<2x4x4xbf16>, vector<2x4x16xbf16>, vector<2x4x16xf32> -> vector<2x4x16xf32>
    "tpu.trace_stop"() : () -> ()
    %118 = vector.shape_cast %117 : vector<2x4x16xf32> to vector<8x16xf32>
    %119 = arith.truncf %118 : vector<8x16xf32> to vector<8x16xbf16>
    %c1_80 = arith.constant 1 : index
    %c0_81 = arith.constant 0 : index
    %c0_82 = arith.constant 0 : index
    %120 = vector.load %arg11[%c1_80, %c0_81, %c0_82] : memref<2x16x32xbf16, #tpu.memory_space<vmem>>, vector<1x16x32xbf16>
    %121 = vector.shape_cast %120 : vector<1x16x32xbf16> to vector<16x32xbf16>
    %cst_83 = arith.constant dense<0.000000e+00> : vector<8x32xf32>
    %122 = tpu.matmul %119, %121, %cst_83 {dimension_numbers = #tpu.dot_dimension_numbers<[1], [0], [0], [1], [0, 0, 1, 1], [], []>} : vector<8x16xbf16>, vector<16x32xbf16>, vector<8x32xf32> -> vector<8x32xf32>
    %123 = arith.addf %77, %122 : vector<8x32xf32>
    %c0_84 = arith.constant 0 : index
    %c0_85 = arith.constant 0 : index
    %124 = vector.load %arg12[%c0_84, %c0_85] : memref<1x32xf32, #tpu.memory_space<vmem>>, vector<1x32xf32>
    %125 = vector.broadcast %124 : vector<1x32xf32> to vector<8x32xf32>
    %126 = arith.addf %123, %125 : vector<8x32xf32>
    %127 = arith.addf %31, %126 : vector<8x32xf32>
    %c0_86 = arith.constant 0 : index
    %c0_87 = arith.constant 0 : index
    %128 = vector.load %arg13[%c0_86, %c0_87] : memref<1x32xf32, #tpu.memory_space<vmem>>, vector<1x32xf32>
    %c0_88 = arith.constant 0 : index
    %c0_89 = arith.constant 0 : index
    %129 = vector.load %arg14[%c0_88, %c0_89] : memref<1x32xf32, #tpu.memory_space<vmem>>, vector<1x32xf32>
    %cst_90 = arith.constant dense<0.000000e+00> : vector<8xf32>
    %130 = vector.multi_reduction <add>, %127, %cst_90 [1] : vector<8x32xf32> to vector<8xf32>
    %131 = vector.shape_cast %130 : vector<8xf32> to vector<8x1xf32>
    %cst_91 = arith.constant 3.200000e+01 : f32
    %132 = vector.broadcast %cst_91 : f32 to vector<8x1xf32>
    %133 = arith.divf %131, %132 : vector<8x1xf32>
    %134 = vector.broadcast %133 : vector<8x1xf32> to vector<8x32xf32>
    %135 = arith.subf %127, %134 : vector<8x32xf32>
    %136 = arith.mulf %135, %135 : vector<8x32xf32>
    %cst_92 = arith.constant dense<0.000000e+00> : vector<8xf32>
    %137 = vector.multi_reduction <add>, %136, %cst_92 [1] : vector<8x32xf32> to vector<8xf32>
    %138 = vector.shape_cast %137 : vector<8xf32> to vector<8x1xf32>
    %cst_93 = arith.constant 3.200000e+01 : f32
    %139 = vector.broadcast %cst_93 : f32 to vector<8x1xf32>
    %140 = arith.divf %138, %139 : vector<8x1xf32>
    %141 = vector.broadcast %133 : vector<8x1xf32> to vector<8x32xf32>
    %142 = arith.subf %127, %141 : vector<8x32xf32>
    %cst_94 = arith.constant 9.99999974E-6 : f32
    %143 = vector.broadcast %cst_94 : f32 to vector<8x1xf32>
    %144 = arith.addf %140, %143 : vector<8x1xf32>
    %145 = math.rsqrt %144 : vector<8x1xf32>
    %146 = vector.broadcast %145 : vector<8x1xf32> to vector<8x32xf32>
    %147 = arith.mulf %142, %146 : vector<8x32xf32>
    %148 = vector.broadcast %128 : vector<1x32xf32> to vector<8x32xf32>
    %149 = arith.mulf %147, %148 : vector<8x32xf32>
    %150 = vector.broadcast %129 : vector<1x32xf32> to vector<8x32xf32>
    %151 = arith.addf %149, %150 : vector<8x32xf32>
    %152 = arith.truncf %151 : vector<8x32xf32> to vector<8x32xbf16>
    %c0_95 = arith.constant 0 : index
    %c0_96 = arith.constant 0 : index
    %153 = vector.load %arg15[%c0_95, %c0_96] : memref<32x2048xbf16, #tpu.memory_space<vmem>>, vector<32x2048xbf16>
    %cst_97 = arith.constant dense<0.000000e+00> : vector<8x2048xf32>
    %154 = tpu.matmul %152, %153, %cst_97 {dimension_numbers = #tpu.dot_dimension_numbers<[1], [0], [0], [1], [0, 0, 1, 1], [], []>} : vector<8x32xbf16>, vector<32x2048xbf16>, vector<8x2048xf32> -> vector<8x2048xf32>
    %c0_98 = arith.constant 0 : index
    %c0_99 = arith.constant 0 : index
    %155 = vector.load %arg16[%c0_98, %c0_99] : memref<1x2048xf32, #tpu.memory_space<vmem>>, vector<1x2048xf32>
    %156 = vector.broadcast %155 : vector<1x2048xf32> to vector<8x2048xf32>
    %157 = arith.addf %154, %156 : vector<8x2048xf32>
    %cst_100 = arith.constant 0.000000e+00 : f32
    %158 = vector.broadcast %cst_100 : f32 to vector<8x2048xf32>
    %159 = arith.maximumf %157, %158 : vector<8x2048xf32>
    %160 = arith.truncf %159 : vector<8x2048xf32> to vector<8x2048xbf16>
    %c0_101 = arith.constant 0 : index
    %c0_102 = arith.constant 0 : index
    %161 = vector.load %arg17[%c0_101, %c0_102] : memref<2048x32xbf16, #tpu.memory_space<vmem>>, vector<2048x32xbf16>
    %cst_103 = arith.constant dense<0.000000e+00> : vector<8x32xf32>
    %162 = tpu.matmul %160, %161, %cst_103 {dimension_numbers = #tpu.dot_dimension_numbers<[1], [0], [0], [1], [0, 0, 1, 1], [], []>} : vector<8x2048xbf16>, vector<2048x32xbf16>, vector<8x32xf32> -> vector<8x32xf32>
    %c0_104 = arith.constant 0 : index
    %c0_105 = arith.constant 0 : index
    %163 = vector.load %arg18[%c0_104, %c0_105] : memref<1x32xf32, #tpu.memory_space<vmem>>, vector<1x32xf32>
    %164 = vector.broadcast %163 : vector<1x32xf32> to vector<8x32xf32>
    %165 = arith.addf %162, %164 : vector<8x32xf32>
    %166 = arith.addf %151, %165 : vector<8x32xf32>
    %c0_106 = arith.constant 0 : index
    %c0_107 = arith.constant 0 : index
    %167 = vector.load %arg19[%c0_106, %c0_107] : memref<1x32xf32, #tpu.memory_space<vmem>>, vector<1x32xf32>
    %c0_108 = arith.constant 0 : index
    %c0_109 = arith.constant 0 : index
    %168 = vector.load %arg20[%c0_108, %c0_109] : memref<1x32xf32, #tpu.memory_space<vmem>>, vector<1x32xf32>
    %cst_110 = arith.constant dense<0.000000e+00> : vector<8xf32>
    %169 = vector.multi_reduction <add>, %166, %cst_110 [1] : vector<8x32xf32> to vector<8xf32>
    %170 = vector.shape_cast %169 : vector<8xf32> to vector<8x1xf32>
    %cst_111 = arith.constant 3.200000e+01 : f32
    %171 = vector.broadcast %cst_111 : f32 to vector<8x1xf32>
    %172 = arith.divf %170, %171 : vector<8x1xf32>
    %173 = vector.broadcast %172 : vector<8x1xf32> to vector<8x32xf32>
    %174 = arith.subf %166, %173 : vector<8x32xf32>
    %175 = arith.mulf %174, %174 : vector<8x32xf32>
    %cst_112 = arith.constant dense<0.000000e+00> : vector<8xf32>
    %176 = vector.multi_reduction <add>, %175, %cst_112 [1] : vector<8x32xf32> to vector<8xf32>
    %177 = vector.shape_cast %176 : vector<8xf32> to vector<8x1xf32>
    %cst_113 = arith.constant 3.200000e+01 : f32
    %178 = vector.broadcast %cst_113 : f32 to vector<8x1xf32>
    %179 = arith.divf %177, %178 : vector<8x1xf32>
    %180 = vector.broadcast %172 : vector<8x1xf32> to vector<8x32xf32>
    %181 = arith.subf %166, %180 : vector<8x32xf32>
    %cst_114 = arith.constant 9.99999974E-6 : f32
    %182 = vector.broadcast %cst_114 : f32 to vector<8x1xf32>
    %183 = arith.addf %179, %182 : vector<8x1xf32>
    %184 = math.rsqrt %183 : vector<8x1xf32>
    %185 = vector.broadcast %184 : vector<8x1xf32> to vector<8x32xf32>
    %186 = arith.mulf %181, %185 : vector<8x32xf32>
    %187 = vector.broadcast %167 : vector<1x32xf32> to vector<8x32xf32>
    %188 = arith.mulf %186, %187 : vector<8x32xf32>
    %189 = vector.broadcast %168 : vector<1x32xf32> to vector<8x32xf32>
    %190 = arith.addf %188, %189 : vector<8x32xf32>
    %191 = vector.shape_cast %190 : vector<8x32xf32> to vector<2x4x32xf32>
    %cst_115 = arith.constant dense<0.000000e+00> : vector<2x32xf32>
    %192 = vector.multi_reduction <add>, %191, %cst_115 [1] : vector<2x4x32xf32> to vector<2x32xf32>
    %cst_116 = arith.constant 4.000000e+00 : f32
    %193 = vector.broadcast %cst_116 : f32 to vector<2x32xf32>
    %194 = arith.divf %192, %193 : vector<2x32xf32>
    %195 = arith.truncf %194 : vector<2x32xf32> to vector<2x32xbf16>
    %c0_117 = arith.constant 0 : index
    %c0_118 = arith.constant 0 : index
    %196 = vector.load %arg21[%c0_117, %c0_118] : memref<32x128xbf16, #tpu.memory_space<vmem>>, vector<32x128xbf16>
    %cst_119 = arith.constant dense<0.000000e+00> : vector<2x128xf32>
    %197 = tpu.matmul %195, %196, %cst_119 {dimension_numbers = #tpu.dot_dimension_numbers<[1], [0], [0], [1], [0, 0, 1, 1], [], []>} : vector<2x32xbf16>, vector<32x128xbf16>, vector<2x128xf32> -> vector<2x128xf32>
    %c0_120 = arith.constant 0 : index
    %c0_121 = arith.constant 0 : index
    %198 = vector.load %arg22[%c0_120, %c0_121] : memref<1x128xf32, #tpu.memory_space<vmem>>, vector<1x128xf32>
    %199 = vector.broadcast %198 : vector<1x128xf32> to vector<2x128xf32>
    %200 = arith.addf %197, %199 : vector<2x128xf32>
    %c0_122 = arith.constant 0 : index
    %c0_123 = arith.constant 0 : index
    %201 = vector.load %arg23[%c0_122, %c0_123] : memref<2x128xf32, #tpu.memory_space<vmem>>, vector<2x128xf32>
    tpu.vector_store %arg23[%c0_122, %c0_123], %200 {strides = array<i32>} : memref<2x128xf32, #tpu.memory_space<vmem>>, vector<2x128xf32>,
    return
  }
}

</mosaic_0001>

<bundles_post_ra>
// kernel: cnn_transformer_forward.1
= control target key start
LH: loop header
LB: loop body
LE: loop exit
PB: predicated region body
PF: predicated region fallthrough
CT: control target
= control target key end

     0   :  { %vm563_vm0 = vcmask 1040384   ;;  %vm564_vm1 = vcmask 1041408   ;;  %v5374_v51 = vmov 65535   ;;  %vm556_vm2 = vcmask 23552   ;;  %s6578_s1 = inlined_call_operand.vmem [shape: bf16[771,128], index: 1, kind: input, shape index: {}]   ;;  %s6579_s0 = inlined_call_operand.vmem [shape: bf16[32,771], index: 0, kind: input, shape index: {}]   ;;  %s6580_s3 = inlined_call_operand.vmem [shape: bf16[384,32], index: 3, kind: input, shape index: {}]   ;;  %s6581_s2 = inlined_call_operand.vmem [shape: f32[1,128], index: 2, kind: input, shape index: {}]   ;;  %s6582_s5 = inlined_call_operand.vmem [shape: bf16[2,32,16], index: 5, kind: input, shape index: {}]   ;;  %s6583_s9 = inlined_call_operand.vmem [shape: bf16[2,32,16], index: 9, kind: input, shape index: {}]   ;;  %s6584_s7 = inlined_call_operand.vmem [shape: bf16[2,32,16], index: 7, kind: input, shape index: {}]   ;;  %s6585_s4 = inlined_call_operand.vmem [shape: f32[1,32], index: 4, kind: input, shape index: {}]   ;;  %s6586_s10 = inlined_call_operand.vmem [shape: f32[2,1,16], index: 10, kind: input, shape index: {}]   ;;  %s6587_s8 = inlined_call_operand.vmem [shape: f32[2,1,16], index: 8, kind: input, shape index: {}]   ;;  %s6588_s6 = inlined_call_operand.vmem [shape: f32[2,1,16], index: 6, kind: input, shape index: {}]   ;;  %s6589_s11 = inlined_call_operand.vmem [shape: bf16[2,16,32], index: 11, kind: input, shape index: {}]   ;;  %s6590_s12 = inlined_call_operand.vmem [shape: f32[1,32], index: 12, kind: input, shape index: {}]   ;;  %s6591_s15 = inlined_call_operand.vmem [shape: bf16[32,2048], index: 15, kind: input, shape index: {}]   ;;  %s6592_s17 = inlined_call_operand.vmem [shape: bf16[2048,32], index: 17, kind: input, shape index: {}]   ;;  %s6593_s13 = inlined_call_operand.vmem [shape: f32[1,32], index: 13, kind: input, shape index: {}]   ;;  %s6594_s14 = inlined_call_operand.vmem [shape: f32[1,32], index: 14, kind: input, shape index: {}]   ;;  %s6595_s16 = inlined_call_operand.vmem [shape: f32[1,2048], index: 16, kind: input, shape index: {}]   ;;  %s6596_s18 = inlined_call_operand.vmem [shape: f32[1,32], index: 18, kind: input, shape index: {}]   ;;  %s6597_s21 = inlined_call_operand.vmem [shape: bf16[32,128], index: 21, kind: input, shape index: {}]   ;;  %s6598_s19 = inlined_call_operand.vmem [shape: f32[1,32], index: 19, kind: input, shape index: {}]   ;;  %s6599_s20 = inlined_call_operand.vmem [shape: f32[1,32], index: 20, kind: input, shape index: {}]   ;;  %s6600_s22 = inlined_call_operand.vmem [shape: f32[1,128], index: 22, kind: input, shape index: {}]   ;;  %s6601_s23 = inlined_call_operand.vmem [shape: f32[2,128], index: 23, kind: output, shape index: {}]  }
   0x1   :  { %6608 = sst [smem:[#allocation4_spill]] %s6578_s1  ;;  %v565_v52 = vsel %vm563_vm0, 4294967295, %v5374_v51  ;;  %vm5376_vm3 = vmmov 0   ;;  %vm4397_vm4 = vmneg %vm563_vm0  ;;  %vm795_vm5 = vcmask 1046528   ;;  %vm1084_vm8 = vcmask 261120  }
   0x2   :  { %6609 = sst [smem:[#allocation5_spill]] %s6579_s0  ;;  %s6616_s24 = sld [smem:[#allocation4_spill]]  ;;  %v566_v56 = vsel %vm564_vm1, %v565_v52, 0  ;;  %vm4399_vm6 = vmpackc.low %vm4397_vm4, %vm4397_vm4  ;;  %vm1291_vm9 = vcmask 130048   ;;  %vm1442_vm10 = vcmask 27648   ;;  %vm1469_vm11 = vcmask 31744  }
   0x3   :  { %6610 = sst [smem:[#allocation6_spill]] %s6580_s3  ;;  %s6617_s27 = sld [smem:[#allocation5_spill]]  ;;  %vm4402_vm7 = vmpackc.low %vm795_vm5, %vm795_vm5  ;;  %vm4208_vm12 = vcmask 257024   ;;  %vm4243_vm13 = vcmask 1041409  }
   0x4   :  { %6611 = sst [smem:[#allocation7_spill]] %s6581_s2  ;;  %s6618_s3 = sld [smem:[#allocation6_spill]] }
   0x5   :  { %6612 = sst [smem:[#allocation8_spill]] %s6582_s5  ;;  %s6619_s1 = sld [smem:[#allocation7_spill]] }
   0x6   :  { %6613 = sst [smem:[#allocation9_spill]] %s6583_s9  ;;  %s6620_s30 = sld [smem:[#allocation8_spill]] }
   0x7   :  { %6614 = sst [smem:[#allocation10_spill]] %s6584_s7  ;;  %s6621_s0 = sld [smem:[#allocation9_spill]] }
   0x8   :  { %6615 = sst [smem:[#allocation11_spill]] %s6585_s4  ;;  %v5117_v0 = vld [vmem:[%s6616_s24 + $0x40] sm:$0xff]   ;;  %v5121_v4 = vld [vmem:[%s6616_s24 + $0x48] sm:$0xff]   ;;  %v5125_v8 = vld [vmem:[%s6616_s24 + $0x50] sm:$0xff]  }
   0x9   :  { %v5118_v1 = vld [vmem:[%s6616_s24] sm:$0xff]   ;;  %4640 = vmatprep.subr.bf16.mxu0 %v5117_v0  ;;  %v5122_v5 = vld [vmem:[%s6616_s24 + $0x8] sm:$0xff]   ;;  %v5126_v9 = vld [vmem:[%s6616_s24 + $0x10] sm:$0xff]  }
   0xa   :  { %v5119_v2 = vld [vmem:[%s6616_s24 + $0xc0] sm:$0xff]   ;;  %4641 = vmatpush3.bf16.msra.mxu0 %v5118_v1  ;;  %v5123_v6 = vld [vmem:[%s6616_s24 + $0xc8] sm:$0xff]   ;;  %v5127_v10 = vld [vmem:[%s6616_s24 + $0xd0] sm:$0xff]  }
   0xb   :  { %v5120_v3 = vld [vmem:[%s6616_s24 + $0x80] sm:$0xff]   ;;  %4668 = vmatprep.subr.bf16.mxu1 %v5119_v2  ;;  %4642 = vmatprep.subr.bf16.mxu0 %v5121_v4  ;;  %v5124_v7 = vld [vmem:[%s6616_s24 + $0x88] sm:$0xff]   ;;  %v5128_v11 = vld [vmem:[%s6616_s24 + $0x90] sm:$0xff]  }
   0xc   :  { %4669 = vmatpush3.bf16.msra.mxu1 %v5120_v3  ;;  %v5129_v12 = vld [vmem:[%s6616_s24 + $0x58] sm:$0xff]   ;;  %v5133_v16 = vld [vmem:[%s6616_s24 + $0x60] sm:$0xff]   ;;  %v5137_v20 = vld [vmem:[%s6616_s24 + $0x68] sm:$0xff]  }
   0xd   :  { %4670 = vmatprep.subr.bf16.mxu1 %v5123_v6  ;;  %v5130_v13 = vld [vmem:[%s6616_s24 + $0x18] sm:$0xff]   ;;  %v5134_v17 = vld [vmem:[%s6616_s24 + $0x20] sm:$0xff]   ;;  %v5138_v21 = vld [vmem:[%s6616_s24 + $0x28] sm:$0xff]  }
   0xe   :  { %4643 = vmatpush3.bf16.msra.mxu0 %v5122_v5  ;;  %v5131_v14 = vld [vmem:[%s6616_s24 + $0xd8] sm:$0xff]   ;;  %v5135_v18 = vld [vmem:[%s6616_s24 + $0xe0] sm:$0xff]   ;;  %v5139_v22 = vld [vmem:[%s6616_s24 + $0xe8] sm:$0xff]   ;;  %v5375_v5 = vmov 0.0  }
   0xf   :  { %4644 = vmatprep.subr.bf16.mxu0 %v5125_v8  ;;  %v5132_v15 = vld [vmem:[%s6616_s24 + $0x98] sm:$0xff]   ;;  %v5136_v19 = vld [vmem:[%s6616_s24 + $0xa0] sm:$0xff]   ;;  %v5140_v23 = vld [vmem:[%s6616_s24 + $0xa8] sm:$0xff]  }
  0x10   :  { %4671 = vmatpush3.bf16.msra.mxu1 %v5124_v7  ;;  %v5141_v24 = vld [vmem:[%s6616_s24 + $0x70] sm:$0xff]   ;;  %v5145_v28 = vld [vmem:[%s6616_s24 + $0x78] sm:$0xff]   ;;  %v5150_v32 = vld [vmem:[%s6617_s27 + $0x4] ss:$28 sps:$4 sm:$0xff]  }
  0x11   :  { %4672 = vmatprep.subr.bf16.mxu1 %v5127_v10  ;;  %v5142_v25 = vld [vmem:[%s6616_s24 + $0x30] sm:$0xff]   ;;  %v5146_v29 = vld [vmem:[%s6616_s24 + $0x38] sm:$0xff]   ;;  %602 = vmatprep.mubr.bf16.mxu0 %v5150_v32  ;;  %v5152_v34 = vld [vmem:[%s6616_s24 + $0x140] sm:$0xff]  }
  0x12   :  { %4645 = vmatpush3.bf16.msra.mxu0 %v5126_v9  ;;  %v5143_v26 = vld [vmem:[%s6616_s24 + $0xf0] sm:$0xff]   ;;  %v5147_v30 = vld [vmem:[%s6616_s24 + $0xf8] sm:$0xff]   ;;  %v5153_v35 = vld [vmem:[%s6617_s27 + $0x8] ss:$28 sps:$4 sm:$0xff]  }
  0x13   :  { %4646 = vmatprep.subr.bf16.mxu0 %v5129_v12  ;;  %v5144_v27 = vld [vmem:[%s6616_s24 + $0xb0] sm:$0xff]   ;;  %v5148_v31 = vld [vmem:[%s6617_s27] ss:$28 sps:$4 sm:$0xff]   ;;  %v5155_v36 = vld [vmem:[%s6617_s27 + $0xc] ss:$28 sps:$4 sm:$0xff]  }
  0x14   :  { %4673 = vmatpush3.bf16.msra.mxu1 %v5128_v11  ;;  %v5151_v33 = vld [vmem:[%s6616_s24 + $0xb8] sm:$0xff]   ;;  %v5156_v37 = vld [vmem:[%s6616_s24 + $0x100] sm:$0xff]   ;;  %651 = vmatprep.mubr.bf16.mxu1 %v5155_v36  ;;  %v5157_v38 = vld [vmem:[%s6616_s24 + $0x148] sm:$0xff]  }
  0x15   :  { %4674 = vmatprep.subr.bf16.mxu1 %v5131_v14  ;;  %v5158_v39 = vld [vmem:[%s6616_s24 + $0x108] sm:$0xff]   ;;  %v5159_v40 = vld [vmem:[%s6616_s24 + $0x150] sm:$0xff]   ;;  %v5161_v42 = vld [vmem:[%s6616_s24 + $0x158] sm:$0xff]  }
  0x16   :  { %4647 = vmatpush3.bf16.msra.mxu0 %v5130_v13  ;;  %v5160_v41 = vld [vmem:[%s6616_s24 + $0x110] sm:$0xff]   ;;  %v5165_v43 = vld [vmem:[%s6617_s27 + $0x3c] ss:$28 sps:$4 sm:$0xff]   ;;  %v5163_v46 = vld [vmem:[%s6616_s24 + $0x160] sm:$0xff]  }
  0x17   :  { %4648 = vmatprep.subr.bf16.mxu0 %v5133_v16  ;;  %v5162_v44 = vld [vmem:[%s6616_s24 + $0x118] sm:$0xff]   ;;  %v5170_v47 = vld [vmem:[%s6617_s27 + $0x44] ss:$28 sps:$4 sm:$0xff]   ;;  %v5167_v50 = vld [vmem:[%s6616_s24 + $0x168] sm:$0xff]  }
  0x18   :  { %4675 = vmatpush3.bf16.msra.mxu1 %v5132_v15  ;;  %v5168_v45 = vld [vmem:[%s6617_s27 + $0x38] ss:$28 sps:$4 sm:$0xff]   ;;  %v5172_v48 = vld [vmem:[%s6617_s27 + $0x40] ss:$28 sps:$4 sm:$0xff]   ;;  %v5169_v53 = vld [vmem:[%s6616_s24 + $0x128] sm:$0xff]  }
  0x19   :  { %4676 = vmatprep.subr.bf16.mxu1 %v5135_v18  ;;  %v5164_v49 = vld [vmem:[%s6616_s24 + $0x120] sm:$0xff]   ;;  %v5173_v54 = vld [vmem:[%s6616_s24 + $0x170] sm:$0xff]   ;;  %v5175_v61 = vld [vmem:[%s6616_s24 + $0x178] sm:$0xff]  }
  0x1a   :  { %4649 = vmatpush3.bf16.msra.mxu0 %v5134_v17  ;;  %v5179_v55 = vld [vmem:[%s6617_s27 + $0x14] ss:$28 sps:$4 sm:$0xff]   ;;  %v5180_v57 = vld [vmem:[%s6616_s24 + $0x180] ss:$0 sps:$4 sm:$0x33]   ;;  %v5176_v63 = vld [vmem:[%s6616_s24 + $0x138] sm:$0xff]  }
  0x1b   :  { %4650 = vmatprep.subr.bf16.mxu0 %v5137_v20  ;;  %v5181_v58 = vld [vmem:[%s6617_s27 + $0x18] ss:$28 sps:$4 sm:$0xff]   ;;  %v568_v59 = vand.u32 %v5180_v57, %v566_v56  ;;  %v5182_v62 = vld [vmem:[%s6617_s27 + $0x50] ss:$28 sps:$4 sm:$0xff]   ;;  %v5185_v2 = vld [vmem:[%s6617_s27 + $0x48] ss:$28 sps:$4 sm:$0xff]  }
  0x1c   :  { %4677 = vmatpush3.bf16.msra.mxu1 %v5136_v19  ;;  %v5174_v60 = vld [vmem:[%s6616_s24 + $0x130] sm:$0xff]   ;;  %v5183_v1 = vld [vmem:[%s6617_s27 + $0x4c] ss:$28 sps:$4 sm:$0xff]   ;;  %v5186_v3 = vld [vmem:[%s6618_s3 + $0x40] sm:$0xff]  }
  0x1d   :  { %4678 = vmatprep.subr.bf16.mxu1 %v5139_v22  ;;  %v5177_v0 = vld [vmem:[%s6617_s27 + $0x10] ss:$28 sps:$4 sm:$0xff]   ;;  %v5187_v4 = vld [vmem:[%s6618_s3] sm:$0xff]   ;;  %v5195_v13 = vld [vmem:[%s6618_s3 + $0x58] sm:$0xff]   ;;  %s6622_s27 = sld [smem:[#allocation11_spill]] }
  0x1e   :  { %4651 = vmatpush3.bf16.msra.mxu0 %v5138_v21  ;;  %v5188_v6 = vld [vmem:[%s6618_s3 + $0x80] sm:$0xff]   ;;  %v5189_v7 = vld [vmem:[%s6618_s3 + $0x48] sm:$0xff]   ;;  %v5192_v10 = vld [vmem:[%s6618_s3 + $0x50] sm:$0xff]  }
  0x1f   :  { %4652 = vmatprep.subr.bf16.mxu0 %v5141_v24  ;;  %v5190_v8 = vld [vmem:[%s6618_s3 + $0x8] sm:$0xff]   ;;  %v5193_v11 = vld [vmem:[%s6618_s3 + $0x10] sm:$0xff]   ;;  %v5196_v14 = vld [vmem:[%s6618_s3 + $0x18] sm:$0xff]  }
  0x20   :  { %4679 = vmatpush3.bf16.msra.mxu1 %v5140_v23  ;;  %v5191_v9 = vld [vmem:[%s6618_s3 + $0x88] sm:$0xff]   ;;  %v5194_v12 = vld [vmem:[%s6618_s3 + $0x90] sm:$0xff]   ;;  %v5197_v15 = vld [vmem:[%s6618_s3 + $0x98] sm:$0xff]  }
  0x21   :  { %4680 = vmatprep.subr.bf16.mxu1 %v5143_v26  ;;  %v5198_v16 = vld [vmem:[%s6618_s3 + $0x60] sm:$0xff]   ;;  %v5201_v19 = vld [vmem:[%s6618_s3 + $0x68] sm:$0xff]   ;;  %v5204_v22 = vld [vmem:[%s6618_s3 + $0x70] sm:$0xff]  }
  0x22   :  { %4653 = vmatpush3.bf16.msra.mxu0 %v5142_v25  ;;  %v5199_v17 = vld [vmem:[%s6618_s3 + $0x20] sm:$0xff]   ;;  %v5202_v20 = vld [vmem:[%s6618_s3 + $0x28] sm:$0xff]   ;;  %v5205_v23 = vld [vmem:[%s6618_s3 + $0x30] sm:$0xff]  }
  0x23   :  { %4654 = vmatprep.subr.bf16.mxu0 %v5145_v28  ;;  %v5200_v18 = vld [vmem:[%s6618_s3 + $0xa0] sm:$0xff]   ;;  %v5203_v21 = vld [vmem:[%s6618_s3 + $0xa8] sm:$0xff]   ;;  %v5206_v24 = vld [vmem:[%s6618_s3 + $0xb0] sm:$0xff]  }
  0x24   :  { %4681 = vmatpush3.bf16.msra.mxu1 %v5144_v27  ;;  %v5207_v25 = vld [vmem:[%s6618_s3 + $0x78] sm:$0xff]  }
  0x25   :  { %4682 = vmatprep.subr.bf16.mxu1 %v5147_v30  ;;  %v5208_v26 = vld [vmem:[%s6618_s3 + $0x38] sm:$0xff]  }
  0x26   :  { %4655 = vmatpush3.bf16.msra.mxu0 %v5146_v29  ;;  %v5209_v27 = vld [vmem:[%s6618_s3 + $0xb8] sm:$0xff]   ;;  %v4306_v29 = vld [vmem:[%s6619_s1] ss:$0 sm:$0xff]  ;;  %s6623_s3 = sld [smem:[#allocation10_spill]] }
  0x27   :  { %4696 = vmatprep.subr.bf16.mxu0 %v5152_v34 }
  0x28   :  { %4683 = vmatpush3.bf16.msra.mxu1 %v5151_v33 }
  0x29   :  { %603 = vmatmul.mubr.bf16.vlgmr.msra.gmra.mrb[0].mxu0 %v5148_v31  ;;  %4975 = vmatprep.subr.bf16.mxu1 %v568_v59 }
  0x2a   :  { %4697 = vmatpush3.bf16.msra.mxu0 %v5156_v37  ;;  %610 = vmatprep.mubr.bf16.mxu0 %v5165_v43 }
  0x2b   :  { %652 = vmatmul.mubr.bf16.vlgmr.msra.gmra.mrb[0].mxu1 %v5153_v35  ;;  %4698 = vmatprep.subr.bf16.mxu0 %v5157_v38 }
  0x2c   :  { %659 = vmatprep.mubr.bf16.mxu1 %v5170_v47  ;;  %4976 = vmatpush3.bf16.msra.mxu1 %v568_v59 }
  0x2d   :  { %4727 = vmatprep.subr.bf16.mxu1 %v5186_v3 }
  0x2e   :  { %4699 = vmatpush3.bf16.msra.mxu0 %v5158_v39 }
  0x2f   :  { %4700 = vmatprep.subr.bf16.mxu0 %v5159_v40 }
  0x31   :  { %611 = vmatmul.mubr.bf16.gmra.mrb[4].mxu0 %v5168_v45 }
  0x32   :  { %4701 = vmatpush3.bf16.msra.mxu0 %v5160_v41  ;;  %700 = vmatprep.mubr.bf16.mxu0 %v5179_v55 }
  0x33   :  { %4702 = vmatprep.subr.bf16.mxu0 %v5161_v42  ;;  %660 = vmatmul.mubr.bf16.gmra.mrb[4].mxu1 %v5172_v48 }
  0x34   :  { %4977 = vmatprep.mubr.msk.bf16.mxu1 %vm556_vm2, %v5181_v58 }
  0x36   :  { %4703 = vmatpush3.bf16.msra.mxu0 %v5162_v44 }
  0x37   :  { %4704 = vmatprep.subr.bf16.mxu0 %v5163_v46 }
  0x3a   :  { %4705 = vmatpush3.bf16.msra.mxu0 %v5164_v49 }
  0x3b   :  { %4706 = vmatprep.subr.bf16.mxu0 %v5167_v50  ;;  %4978 = vmatmul.mubr.msk.bf16.vlgmr.msra.gmra.mrb[8].mxu1 %vm556_vm2, %v5182_v62 }
  0x3c   :  { %4728 = vmatpush3.bf16.msra.mxu1 %v5187_v4 }
  0x3d   :  { %4729 = vmatprep.subr.bf16.mxu1 %v5189_v7 }
  0x3e   :  { %4707 = vmatpush3.bf16.msra.mxu0 %v5169_v53 }
  0x3f   :  { %4708 = vmatprep.subr.bf16.mxu0 %v5173_v54 }
  0x40   :  { %4730 = vmatpush3.bf16.msra.mxu1 %v5190_v8 }
  0x41   :  { %4731 = vmatprep.subr.bf16.mxu1 %v5192_v10 }
  0x42   :  { %4709 = vmatpush3.bf16.msra.mxu0 %v5174_v60 }
  0x43   :  { %4710 = vmatprep.subr.bf16.mxu0 %v5175_v61 }
  0x44   :  { %4732 = vmatpush3.bf16.msra.mxu1 %v5193_v11 }
  0x45   :  { %4733 = vmatprep.subr.bf16.mxu1 %v5195_v13 }
  0x46   :  { %4711 = vmatpush3.bf16.msra.mxu0 %v5176_v63 }
  0x47   :  { %4981 = vmatprep.subr.bf16.mxu0 %v5375_v5 }
  0x48   :  { %4734 = vmatpush3.bf16.msra.mxu1 %v5196_v14 }
  0x49   :  { %701 = vmatmul.mubr.bf16.vlgmr.msra.gmra.mrb[8].mxu0 %v5177_v0  ;;  %4735 = vmatprep.subr.bf16.mxu1 %v5198_v16 }
  0x4a   :  { %708 = vmatprep.mubr.bf16.mxu0 %v5183_v1  ;;  %4982 = vmatpush3.bf16.msra.mxu0 %v5188_v6 }
  0x4b   :  { %4983 = vmatprep.subr.bf16.mxu0 %v5375_v5 }
  0x4c   :  { %4736 = vmatpush3.bf16.msra.mxu1 %v5199_v17 }
  0x4d   :  { %4737 = vmatprep.subr.bf16.mxu1 %v5201_v19 }
  0x4e   :  { %4984 = vmatpush3.bf16.msra.mxu0 %v5191_v9 }
  0x4f   :  { %4985 = vmatprep.subr.bf16.mxu0 %v5375_v5 }
  0x50   :  { %4738 = vmatpush3.bf16.msra.mxu1 %v5202_v20 }
  0x51   :  { %709 = vmatmul.mubr.bf16.gmra.mrb[12].mxu0 %v5185_v2  ;;  %4739 = vmatprep.subr.bf16.mxu1 %v5204_v22 }
  0x52   :  { %4986 = vmatpush3.bf16.msra.mxu0 %v5194_v12  ;;  %4997 = vmatprep.mubr.msk.bf16.mxu0 %vm5376_vm3, %v5375_v5 }
  0x53   :  { %4987 = vmatprep.subr.bf16.mxu0 %v5375_v5 }
  0x54   :  { %4740 = vmatpush3.bf16.msra.mxu1 %v5205_v23 }
  0x55   :  { %4741 = vmatprep.subr.bf16.mxu1 %v5207_v25 }
  0x56   :  { %4988 = vmatpush3.bf16.msra.mxu0 %v5197_v15 }
  0x57   :  { %4989 = vmatprep.subr.bf16.mxu0 %v5375_v5 }
  0x58   :  { %4742 = vmatpush3.bf16.msra.mxu1 %v5208_v26 }
  0x59   :  { %5001 = vmatprep.subr.bf16.mxu1 %v5375_v5 }
  0x5a   :  { %4990 = vmatpush3.bf16.msra.mxu0 %v5200_v18 }
  0x5b   :  { %4991 = vmatprep.subr.bf16.mxu0 %v5375_v5 }
  0x5e   :  { %4992 = vmatpush3.bf16.msra.mxu0 %v5203_v21 }
  0x5f   :  { %4993 = vmatprep.subr.bf16.mxu0 %v5375_v5 }
  0x62   :  { %4994 = vmatpush3.bf16.msra.mxu0 %v5206_v24 }
  0x63   :  { %4995 = vmatprep.subr.bf16.mxu0 %v5375_v5 }
  0x66   :  { %4996 = vmatpush3.bf16.msra.mxu0 %v5209_v27 }
  0x67   :  { %5017 = vmatprep.subr.bf16.mxu0 %v5375_v5 }
  0xfc   :  { %v4656_v28 = vpop.f32.mrb[0].mxu0 }
  0xfd   :  { %v4657_v30 = vpop.f32.mrb[1].mxu0 }
  0xfe   :  { %v4658_v31 = vadd.f32 %v4657_v30, %v4656_v28  ;;  %v4659_v32 = vpop.f32.mrb[2].mxu0  ;;  %v4684_v33 = vpop.f32.mrb[0].mxu1 }
  0xff   :  { %v4660_v34 = vpop.f32.mrb[3].mxu0  ;;  %v4685_v37 = vpop.f32.mrb[1].mxu1 }
 0x100   :  { %v605_v35 = vadd.f32 %v4658_v31, %v4306_v29  ;;  %v4661_v36 = vadd.f32 %v4660_v34, %v4659_v32  ;;  %v4686_v38 = vadd.f32 %v4685_v37, %v4684_v33  ;;  %v4687_v39 = vpop.f32.mrb[2].mxu1 }
 0x101   :  { %v4688_v41 = vpop.f32.mrb[3].mxu1 }
 0x102   :  { %v608_v40 = vadd.f32 %v4661_v36, %v4306_v29  ;;  %v654_v42 = vadd.f32 %v4686_v38, %v605_v35  ;;  %v4689_v43 = vadd.f32 %v4688_v41, %v4687_v39  ;;  %v5210_v39 = vld [vmem:[%s6620_s30] sm:$0xff]   ;;  %v5212_v41 = vld [vmem:[%s6620_s30 + $0x8] sm:$0xff]  }
 0x104   :  { %v657_v44 = vadd.f32 %v4689_v43, %v608_v40  ;;  %v4662_v45 = vpop.f32.mrb[4].mxu0  ;;  %v5211_v40 = vld [vmem:[%s6621_s0] sm:$0xff]  }
 0x105   :  { %v4663_v46 = vpop.f32.mrb[5].mxu0 }
 0x106   :  { %v4664_v47 = vadd.f32 %v4663_v46, %v4662_v45  ;;  %v4665_v48 = vpop.f32.mrb[6].mxu0  ;;  %v4690_v49 = vpop.f32.mrb[4].mxu1  ;;  %v4372_v45 = vld [vmem:[%s6622_s27] ss:$0 sm:$0xff] }
 0x107   :  { %v4666_v50 = vpop.f32.mrb[7].mxu0  ;;  %v4691_v53 = vpop.f32.mrb[5].mxu1 }
 0x108   :  { %v613_v51 = vadd.f32 %v4664_v47, %v4306_v29  ;;  %v4667_v52 = vadd.f32 %v4666_v50, %v4665_v48  ;;  %v4692_v54 = vadd.f32 %v4691_v53, %v4690_v49  ;;  %v4693_v55 = vpop.f32.mrb[6].mxu1 }
 0x109   :  { %v4694_v57 = vpop.f32.mrb[7].mxu1 }
 0x10a   :  { %v616_v56 = vadd.f32 %v4667_v52, %v4306_v29  ;;  %v662_v58 = vadd.f32 %v4692_v54, %v613_v51  ;;  %v4695_v59 = vadd.f32 %v4694_v57, %v4693_v55 }
 0x10c   :  { %v665_v60 = vadd.f32 %v4695_v59, %v616_v56 }
 0x10e   :  { %v4979_v61 = vpop.f32.mrb[8].mxu1 }
 0x10f   :  { %v751_v62 = vpop.f32.mrb[9].mxu1 }
 0x110   :  { %v4980_v63 = vpop.f32.mrb[10].mxu1 }
 0x111   :  { %v754_v0 = vpop.f32.mrb[11].mxu1 }
 0x11c   :  { %v4712_v1 = vpop.f32.mrb[8].mxu0 }
 0x11d   :  { %v4713_v2 = vpop.f32.mrb[9].mxu0 }
 0x11e   :  { %v4714_v3 = vadd.f32 %v4713_v2, %v4712_v1  ;;  %v4715_v4 = vpop.f32.mrb[10].mxu0  ;;  %v5215_v1 = vld [vmem:[%s6623_s3 + $0x8] sm:$0xff]   ;;  %v4413_v2 = vld [vmem:[%s6586_s10] ss:$0 sm:$0xff] }
 0x11f   :  { %v4716_v6 = vpop.f32.mrb[11].mxu0 }
 0x120   :  { %v4717_v7 = vadd.f32 %v4716_v6, %v4715_v4  ;;  %v703_v8 = vadd.f32 %v4714_v3, %v654_v42  ;;  %v5213_v42 = vld [vmem:[%s6621_s0 + $0x8] sm:$0xff]  }
 0x122   :  { %v752_v9 = vadd.f32 %v751_v62, %v703_v8  ;;  %v706_v10 = vadd.f32 %v4717_v7, %v657_v44 }
 0x124   :  { %v766_v11 = vmax.f32 %v752_v9, 0.0  ;;  %v755_v12 = vadd.f32 %v754_v0, %v706_v10  ;;  %v4718_v13 = vpop.f32.mrb[12].mxu0 }
 0x125   :  { %v4719_v14 = vpop.f32.mrb[13].mxu0 }
 0x126   :  { %770 = vst [vmem:[#allocation2] sm:$0xff] %v766_v11  ;;  %v767_v15 = vmax.f32 %v755_v12, 0.0  ;;  %v4720_v16 = vadd.f32 %v4719_v14, %v4718_v13  ;;  %v4721_v17 = vpop.f32.mrb[14].mxu0 }
 0x127   :  { %v4722_v18 = vpop.f32.mrb[15].mxu0 }
 0x128   :  { %771 = vst [vmem:[#allocation2 + $0x8] sm:$0xff] %v767_v15  ;;  %v711_v19 = vadd.f32 %v4720_v16, %v662_v58  ;;  %v4723_v20 = vadd.f32 %v4722_v18, %v4721_v17  ;;  %v4409_v15 = vld [vmem:[%s6587_s8] ss:$0 sm:$0xff] }
 0x129   :  { %v4405_v17 = vld [vmem:[%s6588_s6] ss:$0 sm:$0xff] }
 0x12a   :  { %v760_v21 = vadd.f32 %v4979_v61, %v711_v19  ;;  %v714_v22 = vadd.f32 %v4723_v20, %v665_v60 }
 0x12c   :  { %v768_v23 = vmax.f32 %v760_v21, 0.0  ;;  %v763_v24 = vadd.f32 %v4980_v63, %v714_v22  ;;  %v5214_v63 = vld [vmem:[%s6623_s3] sm:$0xff]  }
 0x12e   :  { %772 = vst [vmem:[#allocation2 + $0x10] sm:$0xff] %v768_v23  ;;  %v769_v25 = vmax.f32 %v763_v24, 0.0 }
 0x12f   :  { %v774_v26 = vld [vmem:[#allocation2] ss:$2 sm:$0xff]  ;;  %v778_v27 = vld [vmem:[#allocation2 + $0x1] ss:$2 sm:$0xff] }
 0x130   :  { %773 = vst [vmem:[#allocation2 + $0x18] sm:$0xff] %v769_v25  ;;  %v781_v28 = vmax.f32 %v774_v26, %v778_v27 }
 0x132   :  { %v785_v32 = vrot.slane %v781_v28, 7  ;;  %v791_v34 = vrot.slane %v781_v28, 1 }
 0x137   :  { %v776_v29 = vld [vmem:[#allocation2 + $0x10] ss:$2 sm:$0xff]  ;;  %v780_v30 = vld [vmem:[#allocation2 + $0x11] ss:$2 sm:$0xff] }
 0x138   :  { %v782_v31 = vmax.f32 %v776_v29, %v780_v30 }
 0x13a   :  { %v786_v33 = vrot.slane %v782_v31, 7  ;;  %v792_v35 = vrot.slane %v782_v31, 1  ;;  %v799_v36 = vpack.c.bf16 %v782_v31, %v781_v28 }
 0x13c   :  { %1032 = vmatprep.mubr.bf16.mxu1 %v799_v36  ;;  %v4403_v37 = vpack.c.bf16 %v792_v35, %v791_v34  ;;  %v4400_v38 = vpack.c.bf16 %v786_v33, %v785_v32 }
 0x13e   :  { %4401 = vmatmul.mubr.msk.bf16.vlgmr.msra.gmra.mrb[12].mxu1 %vm4399_vm6, %v4400_v38  ;;  %4998 = vmatmul.mubr.msk.bf16.vlgmr.msra.gmra.mrb[16].mxu0 %vm4402_vm7, %v4403_v37 }
 0x13f   :  { %5005 = vmatprep.mubr.msk.bf16.mxu1 %vm5376_vm3, %v5375_v5  ;;  %5021 = vmatprep.mubr.msk.bf16.mxu0 %vm5376_vm3, %v5375_v5 }
 0x140   :  { %5002 = vmatpush3.bf16.msra.mxu1 %v5210_v39  ;;  %5018 = vmatpush3.bf16.msra.mxu0 %v5211_v40 }
 0x141   :  { %5003 = vmatprep.subr.bf16.mxu1 %v5375_v5  ;;  %5019 = vmatprep.subr.bf16.mxu0 %v5375_v5 }
 0x144   :  { %5004 = vmatpush3.bf16.msra.mxu1 %v5212_v41  ;;  %5020 = vmatpush3.bf16.msra.mxu0 %v5213_v42 }
 0x145   :  { %5009 = vmatprep.subr.bf16.mxu1 %v5375_v5  ;;  %5035 = vmatprep.subr.bf16.mxu0 %v5375_v5 }
 0x211   :  { %v4743_v43 = vpop.f32.mrb[12].mxu1  ;;  %v1075_v44 = vpop.f32.mrb[16].mxu0 }
 0x212   :  { %v4744_v46 = vpop.f32.mrb[13].mxu1  ;;  %v4999_v47 = vpop.f32.mrb[17].mxu0 }
 0x213   :  { %v4745_v48 = vadd.f32 %v4744_v46, %v4743_v43  ;;  %v4746_v49 = vpop.f32.mrb[14].mxu1  ;;  %v1078_v50 = vpop.f32.mrb[18].mxu0 }
 0x214   :  { %v4747_v51 = vpop.f32.mrb[15].mxu1  ;;  %v5000_v52 = vpop.f32.mrb[19].mxu0 }
 0x215   :  { %v1035_v53 = vadd.f32 %v4745_v48, %v4372_v45  ;;  %v4748_v54 = vadd.f32 %v4747_v51, %v4746_v49 }
 0x217   :  { %v1076_v55 = vadd.f32 %v1075_v44, %v1035_v53  ;;  %v1038_v56 = vadd.f32 %v4748_v54, %v4372_v45  ;;  %v5217_v54 = vld [vmem:[%s6620_s30 + $0x10] sm:$0xff]  }
 0x219   :  { %v1082_v57 = vmax.f32 %v1076_v55, 0.0  ;;  %v1079_v58 = vadd.f32 %v1078_v50, %v1038_v56  ;;  %v5216_v50 = vld [vmem:[%s6623_s3 + $0x10] sm:$0xff]   ;;  %v5218_v55 = vld [vmem:[%s6623_s3 + $0x18] sm:$0xff]  }
 0x21b   :  { %1085 = vst.msk [vmem:[#allocation3] sm:$0xff] %vm1084_vm8, %v1082_v57  ;;  %v1083_v59 = vmax.f32 %v1079_v58, 0.0  ;;  %v5219_v57 = vld [vmem:[%s6620_s30 + $0x18] sm:$0xff]   ;;  %v5220_v58 = vld [vmem:[%s6621_s0 + $0x10] sm:$0xff]  }
 0x21d   :  { %1086 = vst.msk [vmem:[#allocation3 + $0x8] sm:$0xff] %vm1084_vm8, %v1083_v59  ;;  %v5221_v59 = vld [vmem:[%s6621_s0 + $0x18] sm:$0xff]  }
 0x224   :  { %v1087_v60 = vld [vmem:[#allocation3] ss:$2 sm:$0xff]  ;;  %v1089_v61 = vld [vmem:[#allocation3 + $0x1] ss:$2 sm:$0xff] }
 0x225   :  { %v5804_v62 = vmax.f32 %v1087_v60, %v1089_v61 }
 0x227   :  { %v5811_v0 = vpack.c.bf16 %v5804_v62, %v5804_v62 }
 0x229   :  { %5006 = vmatmul.mubr.msk.bf16.vlgmr.msra.gmra.mrb[16].mxu1 %vm1084_vm8, %v5811_v0  ;;  %5022 = vmatmul.mubr.msk.bf16.vlgmr.msra.gmra.mrb[20].mxu0 %vm1084_vm8, %v5811_v0 }
 0x22a   :  { %5010 = vmatpush3.bf16.msra.mxu1 %v5214_v63  ;;  %5013 = vmatprep.mubr.msk.bf16.mxu1 %vm5376_vm3, %v5375_v5 }
 0x22b   :  { %5011 = vmatprep.subr.bf16.mxu1 %v5375_v5  ;;  %5037 = vmatprep.mubr.msk.bf16.mxu0 %vm5376_vm3, %v5375_v5 }
 0x22e   :  { %5012 = vmatpush3.bf16.msra.mxu1 %v5215_v1 }
 0x22f   :  { %5025 = vmatprep.subr.mxu1 %v5375_v5 }
 0x231   :  { %5014 = vmatmul.mubr.msk.bf16.vlgmr.msra.gmra.mrb[20].mxu1 %vm1084_vm8, %v5811_v0 }
 0x232   :  { %5027 = vmatprep.mubr.msk.f32.mxu1 %vm5376_vm3, %v5375_v5 }
 0x2fc   :  { %v1152_v3 = vpop.f32.mrb[16].mxu1  ;;  %v1282_v4 = vpop.f32.mrb[20].mxu0 }
 0x2fd   :  { %v1283_v6 = vadd.f32 %v4413_v2, %v1282_v4  ;;  %v5007_v7 = vpop.f32.mrb[17].mxu1  ;;  %v5023_v8 = vpop.f32.mrb[21].mxu0  ;;  %v1153_v23 = vadd.f32 %v4405_v17, %v1152_v3 }
 0x2fe   :  { %v1155_v9 = vpop.f32.mrb[18].mxu1  ;;  %v1285_v10 = vpop.f32.mrb[22].mxu0  ;;  %v4437_v7 = vld [vmem:[%s6587_s8 + $0x1] ss:$0 sm:$0xff] }
 0x2ff   :  { %v1467_v11 = vpack.c.bf16 %v1283_v6, %v1283_v6  ;;  %v5008_v12 = vpop.f32.mrb[19].mxu1  ;;  %v5024_v13 = vpop.f32.mrb[23].mxu0  ;;  %v1289_v20 = vcombine.high %v1283_v6, %v1283_v6  ;;  %v1159_v26 = vcombine.high %v1153_v23, %v1153_v23 }
 0x300   :  { %v4428_v12 = vld [vmem:[%s6588_s6 + $0x1] ss:$0 sm:$0xff] }
 0x301   :  { %v1474_v14 = vsel %vm564_vm1, %v1467_v11, 0  ;;  %v1468_v25 = vpack.c.bf16 %v1289_v20, %v1289_v20 }
 0x302   :  { %5036 = vmatpush3.bf16.msra.mxu0 %v1474_v14 }
 0x303   :  { %5047 = vmatprep.subr.bf16.mxu0 %v5375_v5  ;;  %v1520_v27 = vsel %vm564_vm1, %v1468_v25, 0 }
 0x304   :  { %v1217_v16 = vpop.f32.mrb[20].mxu1 }
 0x305   :  { %v1218_v18 = vadd.f32 %v4409_v15, %v1217_v16  ;;  %v5015_v19 = vpop.f32.mrb[21].mxu1 }
 0x306   :  { %v1220_v21 = vpop.f32.mrb[22].mxu1 }
 0x307   :  { %v5016_v22 = vpop.f32.mrb[23].mxu1  ;;  %5026 = vmatpush3.xpose.msk.msra.mxu1 %vm1291_vm9, %v1218_v18  ;;  %v1224_v24 = vcombine.high %v1218_v18, %v1218_v18  ;;  %v4446_v21 = vld [vmem:[%s6586_s10 + $0x1] ss:$0 sm:$0xff] }
 0x308   :  { %5030 = vmatprep.subr.mxu1 %v5375_v5 }
 0x30a   :  { %5028 = vmatmul.mubr.msk.f32.vlgmr.msra.gmra.mrb[24].mxu1 %vm1291_vm9, %v1153_v23 }
 0x30b   :  { %5031 = vmatpush3.xpose.msk.msra.mxu1 %vm1291_vm9, %v1224_v24  ;;  %5032 = vmatprep.mubr.msk.f32.mxu1 %vm5376_vm3, %v5375_v5 }
 0x30c   :  { %5041 = vmatprep.subr.bf16.mxu1 %v5375_v5 }
 0x30e   :  { %5033 = vmatmul.mubr.msk.f32.vlgmr.msra.gmra.mrb[26].mxu1 %vm1291_vm9, %v1159_v26 }
 0x30f   :  { %5042 = vmatpush3.bf16.msra.mxu1 %v1520_v27  ;;  %5043 = vmatprep.mubr.msk.bf16.mxu1 %vm5376_vm3, %v5375_v5 }
 0x310   :  { %5055 = vmatprep.subr.bf16.mxu1 %v5375_v5 }
 0x3dd   :  { %v1362_v28 = vpop.f32.mrb[24].mxu1 }
 0x3de   :  { %v5029_v29 = vpop.f32.mrb[25].mxu1  ;;  %v1440_v33 = vmul.f32 0.25, %v1362_v28 }
 0x3e0   :  { %v1443_v35 = vsel %vm1442_vm10, %v1440_v33, -inf }
 0x3e1   :  { %v1436_v30 = vpop.f32.mrb[26].mxu1 }
 0x3e2   :  { %v1441_v31 = vmul.f32 0.25, %v1436_v30  ;;  %v5034_v32 = vpop.f32.mrb[27].mxu1 }
 0x3e4   :  { %v1446_v34 = vsel %vm1442_vm10, %v1441_v31, -inf }
 0x3e5   :  { %1447 = vmax.xlane.f32.xlu0 %v1446_v34 }
 0x3e9   :  { %1444 = vmax.xlane.f32.xlu0 %v1443_v35 }
 0x472   :  { %v1448_v36 = vpop.xlane.xlu0 %1447 }
 0x473   :  { %v1450_v37 = vsub.f32 %v1441_v31, %v1448_v36 }
 0x475   :  { %v1453_v38 = vmul.f32 1.442695, %v1450_v37 }
 0x476   :  { %v1445_v39 = vpop.xlane.xlu0 %1444 }
 0x477   :  { %5354 = vpow2.f32 %v1453_v38  ;;  %v1449_v40 = vsub.f32 %v1440_v33, %v1445_v39 }
 0x479   :  { %v1451_v41 = vmul.f32 1.442695, %v1449_v40 }
 0x47b   :  { %5356 = vpow2.f32 %v1451_v41 }
 0x481   :  { %v5355_v42 = vpop.eup %5354 }
 0x482   :  { %v1458_v43 = vsel %vm1442_vm10, %v5355_v42, 0.0 }
 0x483   :  { %1459 = vadd.xlane.f32.xlu1 %v1458_v43 }
 0x485   :  { %v5357_v44 = vpop.eup %5356 }
 0x486   :  { %v1455_v45 = vsel %vm1442_vm10, %v5357_v44, 0.0 }
 0x487   :  { %1456 = vadd.xlane.f32.xlu1 %v1455_v45 }
 0x510   :  { %v1460_v46 = vpop.xlane.xlu1 %1459 }
 0x511   :  { %5358 = vrcp.f32 %v1460_v46 }
 0x514   :  { %v1457_v47 = vpop.xlane.xlu1 %1456 }
 0x515   :  { %5360 = vrcp.f32 %v1457_v47 }
 0x51b   :  { %v5359_v48 = vpop.eup %5358 }
 0x51c   :  { %v1464_v49 = vmul.f32 %v5359_v48, %v5355_v42 }
 0x51e   :  { %v1466_v51 = vpack.c.bf16 %v1464_v49, %v1464_v49 }
 0x51f   :  { %v5361_v52 = vpop.eup %5360 }
 0x520   :  { %v1463_v53 = vmul.f32 %v5361_v52, %v5357_v44  ;;  %5044 = vmatmul.mubr.msk.bf16.vlgmr.msra.gmra.mrb[28].mxu1 %vm1469_vm11, %v1466_v51 }
 0x521   :  { %5056 = vmatpush3.bf16.msra.mxu1 %v5216_v50  ;;  %5059 = vmatprep.mubr.msk.bf16.mxu1 %vm5376_vm3, %v5375_v5 }
 0x522   :  { %v1465_v56 = vpack.c.bf16 %v1463_v53, %v1463_v53  ;;  %5057 = vmatprep.subr.bf16.mxu1 %v5375_v5 }
 0x524   :  { %5038 = vmatmul.mubr.msk.bf16.vlgmr.msra.gmra.mrb[24].mxu0 %vm1469_vm11, %v1465_v56 }
 0x525   :  { %5048 = vmatpush3.bf16.msra.mxu0 %v5217_v54  ;;  %5058 = vmatpush3.bf16.msra.mxu1 %v5218_v55 }
 0x526   :  { %5049 = vmatprep.subr.bf16.mxu0 %v5375_v5  ;;  %5051 = vmatprep.mubr.msk.bf16.mxu0 %vm5376_vm3, %v5375_v5 }
 0x527   :  { %5071 = vmatprep.subr.mxu1 %v5375_v5 }
 0x528   :  { %5060 = vmatmul.mubr.msk.bf16.vlgmr.msra.gmra.mrb[32].mxu1 %vm1084_vm8, %v5811_v0 }
 0x529   :  { %5050 = vmatpush3.bf16.msra.mxu0 %v5219_v57  ;;  %5073 = vmatprep.mubr.msk.f32.mxu1 %vm5376_vm3, %v5375_v5  ;;  %v5222_v57 = vld [vmem:[%s6589_s11] sm:$0xff]  }
 0x52a   :  { %5063 = vmatprep.subr.bf16.mxu0 %v5375_v5 }
 0x52c   :  { %5052 = vmatmul.mubr.msk.bf16.vlgmr.msra.gmra.mrb[28].mxu0 %vm1084_vm8, %v5811_v0 }
 0x52d   :  { %5064 = vmatpush3.bf16.msra.mxu0 %v5220_v58  ;;  %5067 = vmatprep.mubr.msk.bf16.mxu0 %vm5376_vm3, %v5375_v5 }
 0x52e   :  { %5065 = vmatprep.subr.bf16.mxu0 %v5375_v5 }
 0x531   :  { %5066 = vmatpush3.bf16.msra.mxu0 %v5221_v59 }
 0x532   :  { %5081 = vmatprep.subr.bf16.mxu0 %v5375_v5 }
 0x534   :  { %5068 = vmatmul.mubr.msk.bf16.vlgmr.msra.gmra.mrb[32].mxu0 %vm1084_vm8, %v5811_v0 }
 0x535   :  { %5083 = vmatprep.mubr.msk.bf16.mxu0 %vm5376_vm3, %v5375_v5 }
 0x5f3   :  { %v1556_v60 = vpop.f32.mrb[28].mxu1 }
 0x5f4   :  { %v5045_v61 = vpop.f32.mrb[29].mxu1 }
 0x5f5   :  { %v1559_v63 = vpop.f32.mrb[30].mxu1 }
 0x5f6   :  { %v5046_v1 = vpop.f32.mrb[31].mxu1 }
 0x5f7   :  { %v1510_v2 = vpop.f32.mrb[24].mxu0 }
 0x5f8   :  { %v5899_v3 = vcombine.low %v1510_v2, %v1556_v60  ;;  %v5039_v4 = vpop.f32.mrb[25].mxu0  ;;  %v5223_v60 = vld [vmem:[%s6589_s11 + $0x8] sm:$0xff]  }
 0x5f9   :  { %v1513_v6 = vpop.f32.mrb[26].mxu0 }
 0x5fa   :  { %v5040_v8 = vpop.f32.mrb[27].mxu0  ;;  %v1566_v59 = vpack.c.bf16 %v5899_v3, %v5899_v3 }
 0x5fb   :  { %v1695_v9 = vpop.f32.mrb[32].mxu1 }
 0x5fc   :  { %v1696_v10 = vadd.f32 %v4437_v7, %v1695_v9  ;;  %v5061_v0 = vpop.f32.mrb[33].mxu1 }
 0x5fd   :  { %v1698_v11 = vpop.f32.mrb[34].mxu1 }
 0x5fe   :  { %v5062_v13 = vpop.f32.mrb[35].mxu1  ;;  %5072 = vmatpush3.xpose.msk.msra.mxu1 %vm1291_vm9, %v1696_v10  ;;  %v1702_v17 = vcombine.high %v1696_v10, %v1696_v10 }
 0x5ff   :  { %v1628_v14 = vpop.f32.mrb[28].mxu0  ;;  %5076 = vmatprep.subr.mxu1 %v5375_v5 }
 0x600   :  { %v1629_v15 = vadd.f32 %v4428_v12, %v1628_v14  ;;  %v5053_v16 = vpop.f32.mrb[29].mxu0  ;;  %v4462_v14 = vld [vmem:[%s6590_s12] ss:$0 sm:$0xff] }
 0x601   :  { %v1631_v18 = vpop.f32.mrb[30].mxu0 }
 0x602   :  { %v5054_v19 = vpop.f32.mrb[31].mxu0  ;;  %5074 = vmatmul.mubr.msk.f32.vlgmr.msra.gmra.mrb[36].mxu1 %vm1291_vm9, %v1629_v15  ;;  %v1635_v20 = vcombine.high %v1629_v15, %v1629_v15 }
 0x603   :  { %5077 = vmatpush3.xpose.msk.msra.mxu1 %vm1291_vm9, %v1702_v17  ;;  %5078 = vmatprep.mubr.msk.f32.mxu1 %vm5376_vm3, %v5375_v5 }
 0x604   :  { %5087 = vmatprep.subr.bf16.mxu1 %v5375_v5 }
 0x606   :  { %5079 = vmatmul.mubr.msk.f32.vlgmr.msra.gmra.mrb[38].mxu1 %vm1291_vm9, %v1635_v20 }
 0x607   :  { %v1762_v22 = vpop.f32.mrb[32].mxu0  ;;  %5089 = vmatprep.mubr.msk.bf16.mxu1 %vm5376_vm3, %v5375_v5 }
 0x608   :  { %v1763_v23 = vadd.f32 %v4446_v21, %v1762_v22  ;;  %v5069_v24 = vpop.f32.mrb[33].mxu0 }
 0x609   :  { %v1765_v25 = vpop.f32.mrb[34].mxu0 }
 0x60a   :  { %v1769_v26 = vcombine.high %v1763_v23, %v1763_v23  ;;  %v1945_v27 = vpack.c.bf16 %v1763_v23, %v1763_v23  ;;  %v5070_v28 = vpop.f32.mrb[35].mxu0 }
 0x60b   :  { %v2193_v28 = vld [vmem:[%s6591_s15 + $0x40] sm:$0xff] }
 0x60c   :  { %v1946_v29 = vpack.c.bf16 %v1769_v26, %v1769_v26  ;;  %v1951_v30 = vsel %vm564_vm1, %v1945_v27, 0  ;;  %v2185_v27 = vld [vmem:[%s6591_s15] sm:$0xff] }
 0x60d   :  { %5082 = vmatpush3.bf16.msra.mxu0 %v1951_v30  ;;  %v2194_v30 = vld [vmem:[%s6591_s15 + $0x48] sm:$0xff] }
 0x60e   :  { %v1997_v31 = vsel %vm564_vm1, %v1946_v29, 0  ;;  %5093 = vmatprep.subr.bf16.mxu0 %v5375_v5  ;;  %v4466_v29 = vcombine.high %v2185_v27, %v2193_v28 }
 0x60f   :  { %5088 = vmatpush3.bf16.msra.mxu1 %v1997_v31  ;;  %v4465_v31 = vcombine.low %v2185_v27, %v2193_v28 }
 0x610   :  { %5099 = vmatprep.subr.bf16.mxu1 %v5375_v5 }
 0x6d5   :  { %v1841_v32 = vpop.f32.mrb[36].mxu1 }
 0x6d6   :  { %v1919_v33 = vmul.f32 0.25, %v1841_v32  ;;  %v5075_v34 = vpop.f32.mrb[37].mxu1 }
 0x6d7   :  { %v2201_v34 = vld [vmem:[%s6591_s15 + $0x80] sm:$0xff] }
 0x6d8   :  { %v1921_v35 = vsel %vm1442_vm10, %v1919_v33, -inf }
 0x6d9   :  { %1922 = vmax.xlane.f32.xlu0 %v1921_v35  ;;  %v1915_v36 = vpop.f32.mrb[38].mxu1  ;;  %v2209_v35 = vld [vmem:[%s6591_s15 + $0xc0] sm:$0xff] }
 0x6da   :  { %v1920_v37 = vmul.f32 0.25, %v1915_v36  ;;  %v5080_v38 = vpop.f32.mrb[39].mxu1  ;;  %v2202_v36 = vld [vmem:[%s6591_s15 + $0x88] sm:$0xff] }
 0x6db   :  { %v2210_v38 = vld [vmem:[%s6591_s15 + $0xc8] sm:$0xff] }
 0x6dc   :  { %v1924_v39 = vsel %vm1442_vm10, %v1920_v37, -inf }
 0x6dd   :  { %1925 = vmax.xlane.f32.xlu1 %v1924_v39  ;;  %v4481_v39 = vcombine.low %v2201_v34, %v2209_v35 }
 0x766   :  { %v1923_v40 = vpop.xlane.xlu0 %1922 }
 0x767   :  { %v1927_v41 = vsub.f32 %v1919_v33, %v1923_v40  ;;  %v4483_v40 = vcombine.low %v2202_v36, %v2210_v38 }
 0x769   :  { %v1929_v42 = vmul.f32 1.442695, %v1927_v41  ;;  %v4484_v41 = vcombine.high %v2202_v36, %v2210_v38  ;;  %v5224_v38 = vld [vmem:[%s6592_s17 + $0x40] sm:$0xff]  }
 0x76a   :  { %v1926_v43 = vpop.xlane.xlu1 %1925 }
 0x76b   :  { %5362 = vpow2.f32 %v1929_v42  ;;  %v1928_v44 = vsub.f32 %v1920_v37, %v1926_v43  ;;  %v4482_v37 = vcombine.high %v2201_v34, %v2209_v35  ;;  %v2187_v42 = vld [vmem:[%s6591_s15 + $0x10] sm:$0xff] }
 0x76c   :  { %v2195_v43 = vld [vmem:[%s6591_s15 + $0x50] sm:$0xff] }
 0x76d   :  { %v1931_v45 = vmul.f32 1.442695, %v1928_v44  ;;  %v2188_v44 = vld [vmem:[%s6591_s15 + $0x18] sm:$0xff] }
 0x76f   :  { %5364 = vpow2.f32 %v1931_v45  ;;  %v5377_v45 = vmov 0  }
 0x775   :  { %v5363_v46 = vpop.eup %5362 }
 0x776   :  { %v1933_v47 = vsel %vm1442_vm10, %v5363_v46, 0.0 }
 0x777   :  { %1934 = vadd.xlane.f32.xlu0 %v1933_v47  ;;  %v2196_v47 = vld [vmem:[%s6591_s15 + $0x58] sm:$0xff] }
 0x779   :  { %v5365_v48 = vpop.eup %5364 }
 0x77a   :  { %v1936_v49 = vsel %vm1442_vm10, %v5365_v48, 0.0 }
 0x77b   :  { %1937 = vadd.xlane.f32.xlu1 %v1936_v49  ;;  %v4471_v49 = vcombine.low %v2188_v44, %v2196_v47 }
 0x804   :  { %v1935_v50 = vpop.xlane.xlu0 %1934 }
 0x805   :  { %5366 = vrcp.f32 %v1935_v50  ;;  %v4472_v50 = vcombine.high %v2188_v44, %v2196_v47  ;;  %v5230_v44 = vld [vmem:[%s6592_s17 + $0x8] sm:$0xff]   ;;  %v5233_v47 = vld [vmem:[%s6592_s17 + $0xd0] sm:$0xff]  }
 0x808   :  { %v1938_v51 = vpop.xlane.xlu1 %1937 }
 0x809   :  { %5368 = vrcp.f32 %v1938_v51 }
 0x80f   :  { %v5367_v52 = vpop.eup %5366 }
 0x810   :  { %v1941_v53 = vmul.f32 %v5367_v52, %v5363_v46  ;;  %v4470_v46 = vcombine.high %v2187_v42, %v2195_v43 }
 0x812   :  { %v1943_v54 = vpack.c.bf16 %v1941_v53, %v1941_v53 }
 0x813   :  { %v5369_v55 = vpop.eup %5368 }
 0x814   :  { %v1942_v56 = vmul.f32 %v5369_v55, %v5365_v48  ;;  %5084 = vmatmul.mubr.msk.bf16.vlgmr.msra.gmra.mrb[36].mxu0 %vm1469_vm11, %v1943_v54  ;;  %v4469_v48 = vcombine.low %v2187_v42, %v2195_v43  ;;  %v4463_v55 = vld [vmem:[%s6593_s13] ss:$0 sm:$0xff]  ;;  %v5228_v42 = vld [vmem:[%s6592_s17 + $0x48] sm:$0xff]  }
 0x815   :  { %5095 = vmatprep.mubr.msk.bf16.mxu0 %vm5376_vm3, %v5375_v5  ;;  %5094 = vmatpush3.bf16.msra.mxu0 %v5223_v60  ;;  %v2211_v60 = vld [vmem:[%s6591_s15 + $0xd0] sm:$0xff]  ;;  %v5229_v43 = vld [vmem:[%s6592_s17 + $0xc8] sm:$0xff]  }
 0x816   :  { %v1944_v58 = vpack.c.bf16 %v1942_v56, %v1942_v56  ;;  %2464 = vmatprep.subr.bf16.mxu0 %v4466_v29  ;;  %v2215_v29 = vld [vmem:[%s6591_s15 + $0xf0] sm:$0xff] }
 0x818   :  { %5090 = vmatmul.mubr.msk.bf16.vlgmr.msra.gmra.mrb[40].mxu1 %vm1469_vm11, %v1944_v58 }
 0x819   :  { %5100 = vmatpush3.bf16.msra.mxu1 %v5222_v57  ;;  %5101 = vmatprep.mubr.msk.bf16.mxu1 %vm5376_vm3, %v5375_v5  ;;  %v4464_v57 = vld [vmem:[%s6594_s14] ss:$0 sm:$0xff] }
 0x820   :  { %5102 = vmatmul.mubr.msk.bf16.vlgmr.msra.gmra.mrb[44].mxu1 %vm1291_vm9, %v1566_v59  ;;  %v2203_v59 = vld [vmem:[%s6591_s15 + $0x90] sm:$0xff] }
 0x821   :  { %2537 = vmatprep.mubr.bf16.mxu1 %v5377_v45 }
 0x8e7   :  { %v1987_v61 = vpop.f32.mrb[36].mxu0 }
 0x8e8   :  { %v5085_v63 = vpop.f32.mrb[37].mxu0 }
 0x8e9   :  { %v1990_v1 = vpop.f32.mrb[38].mxu0  ;;  %v2212_v63 = vld [vmem:[%s6591_s15 + $0xd8] sm:$0xff] }
 0x8ea   :  { %v5086_v2 = vpop.f32.mrb[39].mxu0 }
 0x8eb   :  { %v2033_v4 = vpop.f32.mrb[40].mxu1 }
 0x8ec   :  { %v2041_v6 = vcombine.low %v1987_v61, %v2033_v4  ;;  %v5091_v7 = vpop.f32.mrb[41].mxu1  ;;  %v2204_v61 = vld [vmem:[%s6591_s15 + $0x98] sm:$0xff]  ;;  %v4486_v4 = vcombine.high %v2203_v59, %v2211_v60 }
 0x8ed   :  { %v2036_v8 = vpop.f32.mrb[42].mxu1  ;;  %v2189_v7 = vld [vmem:[%s6591_s15 + $0x20] sm:$0xff] }
 0x8ee   :  { %v2043_v9 = vpack.c.bf16 %v2041_v6, %v2041_v6  ;;  %v5092_v10 = vpop.f32.mrb[43].mxu1  ;;  %v4488_v6 = vcombine.high %v2204_v61, %v2212_v63  ;;  %v2197_v8 = vld [vmem:[%s6591_s15 + $0x60] sm:$0xff] }
 0x8ef   :  { %v2198_v10 = vld [vmem:[%s6591_s15 + $0x68] sm:$0xff] }
 0x8f0   :  { %5096 = vmatmul.mubr.msk.bf16.vlgmr.msra.gmra.mrb[40].mxu0 %vm1291_vm9, %v2043_v9  ;;  %v2190_v9 = vld [vmem:[%s6591_s15 + $0x28] sm:$0xff] }
 0x8f1   :  { %2465 = vmatpush1.bf16.msra.mxu0 %v4465_v31  ;;  %2496 = vmatprep.mubr.bf16.mxu0 %v5377_v45  ;;  %v2216_v31 = vld [vmem:[%s6591_s15 + $0xf8] sm:$0xff] }
 0x8f2   :  { %2466 = vmatprep.subr.bf16.mxu0 %v4482_v37 }
 0x8f3   :  { %v2139_v3 = vpop.f32.mrb[44].mxu1 }
 0x8f4   :  { %v5103_v0 = vpop.f32.mrb[45].mxu1 }
 0x8f5   :  { %v2142_v11 = vpop.f32.mrb[46].mxu1  ;;  %2467 = vmatpush1.bf16.msra.mxu0 %v4481_v39  ;;  %v4487_v0 = vcombine.low %v2204_v61, %v2212_v63  ;;  %v5225_v39 = vld [vmem:[%s6592_s17 + $0xc0] sm:$0xff]   ;;  %v5247_v61 = vld [vmem:[%s6592_s17 + $0xa8] sm:$0xff]   ;;  %v5248_v63 = vld [vmem:[%s6592_s17 + $0x70] sm:$0xff]  }
 0x8f6   :  { %v5104_v12 = vpop.f32.mrb[47].mxu1  ;;  %2546 = vmatprep.subr.bf16.mxu0 %v4470_v46  ;;  %v4474_v11 = vcombine.high %v2189_v7, %v2197_v8  ;;  %v5232_v46 = vld [vmem:[%s6592_s17 + $0x50] sm:$0xff]  }
 0x8f7   :  { %v4476_v12 = vcombine.high %v2190_v9, %v2198_v10 }
 0x9c3   :  { %v2090_v13 = vpop.f32.mrb[40].mxu0 }
 0x9c4   :  { %v2140_v15 = vadd.f32 %v2139_v3, %v2090_v13  ;;  %v5097_v16 = vpop.f32.mrb[41].mxu0  ;;  %v4485_v3 = vcombine.low %v2203_v59, %v2211_v60  ;;  %v2205_v13 = vld [vmem:[%s6591_s15 + $0xa0] sm:$0xff]  ;;  %v5245_v59 = vld [vmem:[%s6592_s17 + $0xe8] sm:$0xff]  }
 0x9c5   :  { %v2093_v17 = vpop.f32.mrb[42].mxu0  ;;  %v2214_v16 = vld [vmem:[%s6591_s15 + $0xe8] sm:$0xff] }
 0x9c6   :  { %v2152_v18 = vadd.f32 %v4462_v14, %v2140_v15  ;;  %v5098_v19 = vpop.f32.mrb[43].mxu0  ;;  %v2213_v14 = vld [vmem:[%s6591_s15 + $0xe0] sm:$0xff]  ;;  %v2206_v15 = vld [vmem:[%s6591_s15 + $0xa8] sm:$0xff]  ;;  %v4473_v17 = vcombine.low %v2189_v7, %v2197_v8  ;;  %v5252_v7 = vld [vmem:[%s6592_s17 + $0x78] sm:$0xff]  }
 0x9c7   :  { %v4490_v19 = vcombine.high %v2205_v13, %v2213_v14  ;;  %v5246_v60 = vld [vmem:[%s6592_s17 + $0x28] sm:$0xff]   ;;  %v5253_v8 = vld [vmem:[%s6592_s17 + $0xf8] sm:$0xff]  }
 0x9c8   :  { %v2153_v20 = vadd.f32 %v2152_v18, %v5804_v62  ;;  %v2186_v62 = vld [vmem:[%s6591_s15 + $0x8] sm:$0xff]  ;;  %v4475_v18 = vcombine.low %v2190_v9, %v2198_v10  ;;  %v5254_v9 = vld [vmem:[%s6592_s17 + $0x38] sm:$0xff]  }
 0x9c9   :  { %v4467_v32 = vcombine.low %v2186_v62, %v2194_v30  ;;  %v4468_v33 = vcombine.high %v2186_v62, %v2194_v30  ;;  %v2207_v62 = vld [vmem:[%s6591_s15 + $0xb0] sm:$0xff]  ;;  %v2208_v30 = vld [vmem:[%s6591_s15 + $0xb8] sm:$0xff] }
 0x9ca   :  { %v2156_v21 = vsel %vm1084_vm8, %v2153_v20, 0.0  ;;  %v4494_v34 = vcombine.high %v2207_v62, %v2215_v29  ;;  %v4496_v35 = vcombine.high %v2208_v30, %v2216_v31  ;;  %v4493_v36 = vcombine.low %v2207_v62, %v2215_v29  ;;  %v5255_v10 = vld [vmem:[%s6592_s17 + $0xb8] sm:$0xff]  }
 0x9cb   :  { %2157 = vadd.xlane.f32.xlu0 %v2156_v21  ;;  %2505 = vmatprep.subr.bf16.mxu1 %v4468_v33  ;;  %v2191_v21 = vld [vmem:[%s6591_s15 + $0x30] sm:$0xff]  ;;  %v4495_v37 = vcombine.low %v2208_v30, %v2216_v31 }
 0x9cc   :  { %2506 = vmatpush1.bf16.msra.mxu1 %v4467_v32 }
 0x9cd   :  { %2507 = vmatprep.subr.bf16.mxu1 %v4484_v41  ;;  %v5227_v41 = vld [vmem:[%s6592_s17 + $0x80] sm:$0xff]  }
 0x9d0   :  { %2508 = vmatpush1.bf16.msra.mxu1 %v4483_v40  ;;  %v5226_v40 = vld [vmem:[%s6592_s17] sm:$0xff]  }
 0x9d1   :  { %2587 = vmatprep.subr.bf16.mxu1 %v4472_v50  ;;  %v5236_v50 = vld [vmem:[%s6592_s17 + $0x58] sm:$0xff]  }
 0xa58   :  { %v2158_v22 = vpop.xlane.xlu0 %2157 }
 0xa59   :  { %v2160_v23 = vmul.f32 0.03125, %v2158_v22  ;;  %v2199_v22 = vld [vmem:[%s6591_s15 + $0x70] sm:$0xff] }
 0xa5a   :  { %v4478_v27 = vcombine.high %v2191_v21, %v2199_v22  ;;  %v4477_v32 = vcombine.low %v2191_v21, %v2199_v22 }
 0xa5b   :  { %v2161_v24 = vsub.f32 %v2153_v20, %v2160_v23  ;;  %v4492_v20 = vcombine.high %v2206_v15, %v2214_v16  ;;  %v2192_v23 = vld [vmem:[%s6591_s15 + $0x38] sm:$0xff] }
 0xa5d   :  { %v2162_v25 = vmul.f32 %v2161_v24, %v2161_v24 }
 0xa5f   :  { %v2163_v26 = vsel %vm1084_vm8, %v2162_v25, 0.0  ;;  %v4489_v25 = vcombine.low %v2205_v13, %v2213_v14  ;;  %v6190_v14 = vld [vmem:[%s6595_s16 + $0x8] sm:$0xff] }
 0xa60   :  { %2164 = vadd.xlane.f32.xlu1 %v2163_v26  ;;  %v4491_v26 = vcombine.low %v2206_v15, %v2214_v16 }
 0xaed   :  { %v2165_v51 = vpop.xlane.xlu1 %2164 }
 0xaee   :  { %v2166_v52 = vmul.f32 0.03125, %v2165_v51  ;;  %v5237_v51 = vld [vmem:[%s6592_s17 + $0xd8] sm:$0xff]  }
 0xaf0   :  { %v2167_v53 = vadd.f32 1e-05, %v2166_v52  ;;  %v5238_v52 = vld [vmem:[%s6592_s17 + $0x18] sm:$0xff]  }
 0xaf2   :  { %5370 = vrsqrt.f32 %v2167_v53  ;;  %v5239_v53 = vld [vmem:[%s6592_s17 + $0x98] sm:$0xff]  }
 0xafc   :  { %v5371_v54 = vpop.eup %5370 }
 0xafd   :  { %v2169_v56 = vmul.f32 %v5371_v54, %v2161_v24  ;;  %v2200_v24 = vld [vmem:[%s6591_s15 + $0x78] sm:$0xff]  ;;  %v5240_v54 = vld [vmem:[%s6592_s17 + $0x60] sm:$0xff]  }
 0xafe   :  { %v4480_v28 = vcombine.high %v2192_v23, %v2200_v24  ;;  %v4479_v33 = vcombine.low %v2192_v23, %v2200_v24 }
 0xaff   :  { %v2176_v58 = vmul.f32 %v4463_v55, %v2169_v56  ;;  %v5241_v55 = vld [vmem:[%s6592_s17 + $0xe0] sm:$0xff]  }
 0xb00   :  { %v5242_v56 = vld [vmem:[%s6592_s17 + $0x20] sm:$0xff]  }
 0xb01   :  { %v6006_v1 = vadd.f32 %v4464_v57, %v2176_v58  ;;  %v5243_v57 = vld [vmem:[%s6592_s17 + $0xa0] sm:$0xff]   ;;  %v5244_v58 = vld [vmem:[%s6592_s17 + $0x68] sm:$0xff]  }
 0xb03   :  { %v6010_v2 = vpack.c.bf16 %v6006_v1, %v6006_v1 }
 0xb05   :  { %4497 = vmatmul.mubr.msk.bf16.vlgmr.msra.gmra.mrb[44].mxu0 %vm1084_vm8, %v6010_v2  ;;  %4498 = vmatmul.mubr.msk.bf16.vlgmr.msra.gmra.mrb[48].mxu1 %vm1084_vm8, %v6010_v2 }
 0xb06   :  { %2547 = vmatpush1.bf16.msra.mxu0 %v4469_v48  ;;  %2588 = vmatpush1.bf16.msra.mxu1 %v4471_v49  ;;  %v5234_v48 = vld [vmem:[%s6592_s17 + $0x10] sm:$0xff]  }
 0xb07   :  { %2548 = vmatprep.subr.bf16.mxu0 %v4486_v4  ;;  %2589 = vmatprep.subr.bf16.mxu1 %v4488_v6  ;;  %v5235_v49 = vld [vmem:[%s6592_s17 + $0x90] sm:$0xff]  }
 0xb08   :  { %2578 = vmatprep.mubr.bf16.mxu0 %v5377_v45  ;;  %2619 = vmatprep.mubr.bf16.mxu1 %v5377_v45  ;;  %v5250_v4 = vld [vmem:[%s6592_s17 + $0x30] sm:$0xff]  }
 0xb09   :  { %v5251_v6 = vld [vmem:[%s6592_s17 + $0xb0] sm:$0xff]  }
 0xb0a   :  { %2549 = vmatpush1.bf16.msra.mxu0 %v4485_v3  ;;  %2590 = vmatpush1.bf16.msra.mxu1 %v4487_v0  ;;  %v5256_v3 = vld [vmem:[%s6592_s17 + $0x140] sm:$0xff]  }
 0xb0b   :  { %2628 = vmatprep.subr.bf16.mxu0 %v4474_v11  ;;  %2669 = vmatprep.subr.bf16.mxu1 %v4476_v12  ;;  %v5257_v0 = vld [vmem:[%s6592_s17 + $0x1c0] sm:$0xff]   ;;  %v2221_v11 = vlaneseq }
 0xb0d   :  { %4499 = vmatmul.mubr.msk.bf16.vlgmr.msra.gmra.mrb[48].mxu0 %vm1084_vm8, %v6010_v2  ;;  %4500 = vmatmul.mubr.msk.bf16.vlgmr.msra.gmra.mrb[52].mxu1 %vm1084_vm8, %v6010_v2  ;;  %v6184_v12 = vshrl.u32 %v2221_v11, 7  ;;  %v5266_v11 = vld [vmem:[%s6592_s17 + $0x110] sm:$0xff]  }
 0xb0e   :  { %2629 = vmatpush1.bf16.msra.mxu0 %v4473_v17  ;;  %2670 = vmatpush1.bf16.msra.mxu1 %v4475_v18  ;;  %v6202_v18 = vld [vmem:[%s6595_s16] sm:$0xff] }
 0xb0f   :  { %2630 = vmatprep.subr.bf16.mxu0 %v4490_v19  ;;  %2671 = vmatprep.subr.bf16.mxu1 %v4492_v20  ;;  %v2247_v13 = vsub.s32 6, %v6184_v12  ;;  %v2223_v16 = vsub.s32 0, %v6184_v12  ;;  %v2231_v17 = vsub.s32 2, %v6184_v12  ;;  %v2227_v19 = vsub.s32 1, %v6184_v12 }
 0xb10   :  { %2660 = vmatprep.mubr.bf16.mxu0 %v5377_v45  ;;  %2701 = vmatprep.mubr.bf16.mxu1 %v5377_v45  ;;  %v2235_v20 = vsub.s32 3, %v6184_v12 }
 0xb11   :  { %v6195_v15 = vrot.slane %v6190_v14, %v2247_v13  ;;  %v2224_v21 = vrot.slane %v6202_v18, %v2223_v16  ;;  %v2232_v22 = vrot.slane %v6202_v18, %v2231_v17  ;;  %v2228_v23 = vrot.slane %v6202_v18, %v2227_v19 }
 0xb12   :  { %2631 = vmatpush1.bf16.msra.mxu0 %v4489_v25  ;;  %2672 = vmatpush1.bf16.msra.mxu1 %v4491_v26  ;;  %v2236_v24 = vrot.slane %v6202_v18, %v2235_v20 }
 0xb13   :  { %2710 = vmatprep.subr.bf16.mxu0 %v4478_v27  ;;  %2751 = vmatprep.subr.bf16.mxu1 %v4480_v28 }
 0xb15   :  { %4501 = vmatmul.mubr.msk.bf16.vlgmr.msra.gmra.mrb[52].mxu0 %vm1084_vm8, %v6010_v2  ;;  %4502 = vmatmul.mubr.msk.bf16.vlgmr.msra.gmra.mrb[56].mxu1 %vm1084_vm8, %v6010_v2 }
 0xb16   :  { %2711 = vmatpush1.bf16.msra.mxu0 %v4477_v32  ;;  %2752 = vmatpush1.bf16.msra.mxu1 %v4479_v33 }
 0xb17   :  { %2712 = vmatprep.subr.bf16.mxu0 %v4494_v34  ;;  %2753 = vmatprep.subr.bf16.mxu1 %v4496_v35  ;;  %v2243_v34 = vsub.s32 5, %v6184_v12  ;;  %v2251_v35 = vsub.s32 7, %v6184_v12 }
 0xb18   :  { %2742 = vmatprep.mubr.bf16.mxu0 %v5377_v45  ;;  %2783 = vmatprep.mubr.bf16.mxu1 %v5377_v45  ;;  %v5231_v45 = vld [vmem:[%s6592_s17 + $0x88] sm:$0xff]  }
 0xb1a   :  { %2713 = vmatpush1.bf16.msra.mxu0 %v4493_v36  ;;  %2754 = vmatpush1.bf16.msra.mxu1 %v4495_v37 }
 0xb1b   :  { %4796 = vmatprep.subr.bf16.mxu0 %v5224_v38  ;;  %4818 = vmatprep.subr.bf16.mxu1 %v5225_v39 }
 0xb1d   :  { %4503 = vmatmul.mubr.msk.bf16.vlgmr.msra.gmra.mrb[56].mxu0 %vm1084_vm8, %v6010_v2  ;;  %4504 = vmatmul.mubr.msk.bf16.vlgmr.msra.gmra.mrb[60].mxu1 %vm1084_vm8, %v6010_v2  ;;  %v5249_v2 = vld [vmem:[%s6592_s17 + $0xf0] sm:$0xff]  }
 0xb1e   :  { %4797 = vmatpush3.bf16.msra.mxu0 %v5226_v40  ;;  %4819 = vmatpush3.bf16.msra.mxu1 %v5227_v41 }
 0xb1f   :  { %4798 = vmatprep.subr.bf16.mxu0 %v5228_v42  ;;  %4820 = vmatprep.subr.bf16.mxu1 %v5229_v43 }
 0xb22   :  { %4799 = vmatpush3.bf16.msra.mxu0 %v5230_v44  ;;  %4821 = vmatpush3.bf16.msra.mxu1 %v5231_v45  ;;  %v2244_v44 = vrot.slane %v6202_v18, %v2243_v34  ;;  %v2252_v45 = vrot.slane %v6202_v18, %v2251_v35 }
 0xb23   :  { %4800 = vmatprep.subr.bf16.mxu0 %v5232_v46  ;;  %4822 = vmatprep.subr.bf16.mxu1 %v5233_v47  ;;  %v5258_v46 = vld [vmem:[%s6592_s17 + $0x100] sm:$0xff]  }
 0xb24   :  { %v5259_v47 = vld [vmem:[%s6592_s17 + $0x180] sm:$0xff]  }
 0xb26   :  { %4801 = vmatpush3.bf16.msra.mxu0 %v5234_v48  ;;  %4823 = vmatpush3.bf16.msra.mxu1 %v5235_v49 }
 0xb27   :  { %4802 = vmatprep.subr.bf16.mxu0 %v5236_v50  ;;  %4824 = vmatprep.subr.bf16.mxu1 %v5237_v51  ;;  %v5260_v50 = vld [vmem:[%s6592_s17 + $0x148] sm:$0xff]  }
 0xb28   :  { %v5261_v51 = vld [vmem:[%s6592_s17 + $0x1c8] sm:$0xff]  }
 0xb2a   :  { %4803 = vmatpush3.bf16.msra.mxu0 %v5238_v52  ;;  %4825 = vmatpush3.bf16.msra.mxu1 %v5239_v53 }
 0xb2b   :  { %4804 = vmatprep.subr.bf16.mxu0 %v5240_v54  ;;  %4826 = vmatprep.subr.bf16.mxu1 %v5241_v55 }
 0xb2e   :  { %4805 = vmatpush3.bf16.msra.mxu0 %v5242_v56  ;;  %4827 = vmatpush3.bf16.msra.mxu1 %v5243_v57 }
 0xb2f   :  { %4806 = vmatprep.subr.bf16.mxu0 %v5244_v58  ;;  %4828 = vmatprep.subr.bf16.mxu1 %v5245_v59 }
 0xb32   :  { %4807 = vmatpush3.bf16.msra.mxu0 %v5246_v60  ;;  %4829 = vmatpush3.bf16.msra.mxu1 %v5247_v61  ;;  %v5262_v60 = vld [vmem:[%s6592_s17 + $0x108] sm:$0xff]  }
 0xb33   :  { %4808 = vmatprep.subr.bf16.mxu0 %v5248_v63  ;;  %4830 = vmatprep.subr.bf16.mxu1 %v5249_v2  ;;  %v5263_v61 = vld [vmem:[%s6592_s17 + $0x188] sm:$0xff]  }
 0xb36   :  { %4809 = vmatpush3.bf16.msra.mxu0 %v5250_v4  ;;  %4831 = vmatpush3.bf16.msra.mxu1 %v5251_v6  ;;  %v5264_v4 = vld [vmem:[%s6592_s17 + $0x150] sm:$0xff]  }
 0xb37   :  { %4810 = vmatprep.subr.bf16.mxu0 %v5252_v7  ;;  %4832 = vmatprep.subr.bf16.mxu1 %v5253_v8  ;;  %v5265_v6 = vld [vmem:[%s6592_s17 + $0x1d0] sm:$0xff]  }
 0xb3a   :  { %4811 = vmatpush3.bf16.msra.mxu0 %v5254_v9  ;;  %4833 = vmatpush3.bf16.msra.mxu1 %v5255_v10  ;;  %v2256_v9 = vrot.slane %v6190_v14, %v2223_v16  ;;  %v2264_v10 = vrot.slane %v6190_v14, %v2231_v17  ;;  %v5268_v16 = vld [vmem:[%s6592_s17 + $0x158] sm:$0xff]  }
 0xb3b   :  { %4840 = vmatprep.subr.bf16.mxu0 %v5256_v3  ;;  %4862 = vmatprep.subr.bf16.mxu1 %v5257_v0  ;;  %v5269_v17 = vld [vmem:[%s6592_s17 + $0x1d8] sm:$0xff]  }
 0xbd8   :  { %v2498_v25 = vpop.f32.mrb[44].mxu0  ;;  %v2539_v26 = vpop.f32.mrb[48].mxu1 }
 0xbd9   :  { %v2499_v27 = vadd.f32 %v2498_v25, %v2224_v21  ;;  %v2540_v28 = vadd.f32 %v2539_v26, %v2232_v22  ;;  %v2500_v62 = vpop.f32.mrb[45].mxu0  ;;  %v2541_v29 = vpop.f32.mrb[49].mxu1  ;;  %v5267_v21 = vld [vmem:[%s6592_s17 + $0x190] sm:$0xff]  }
 0xbda   :  { %v2501_v30 = vadd.f32 %v2500_v62, %v2228_v23  ;;  %v2542_v31 = vadd.f32 %v2541_v29, %v2236_v24  ;;  %v2502_v32 = vpop.f32.mrb[46].mxu0  ;;  %v2543_v33 = vpop.f32.mrb[50].mxu1  ;;  %v5270_v29 = vld [vmem:[%s6592_s17 + $0x118] sm:$0xff]  }
 0xbdb   :  { %v2792_v36 = vmax.f32 %v2499_v27, 0.0  ;;  %v2794_v37 = vmax.f32 %v2540_v28, 0.0  ;;  %v2503_v38 = vpop.f32.mrb[47].mxu0  ;;  %v2544_v39 = vpop.f32.mrb[51].mxu1 }
 0xbdc   :  { %v2793_v40 = vmax.f32 %v2501_v30, 0.0  ;;  %v2795_v41 = vmax.f32 %v2542_v31, 0.0  ;;  %v5271_v30 = vld [vmem:[%s6592_s17 + $0x198] sm:$0xff]   ;;  %v2239_v31 = vsub.s32 4, %v6184_v12  ;;  %v5274_v39 = vld [vmem:[%s6592_s17 + $0x120] sm:$0xff]  }
 0xbdd   :  { %v2808_v48 = vpack.c.bf16 %v2792_v36, %v2792_v36  ;;  %v2810_v49 = vpack.c.bf16 %v2794_v37, %v2794_v37  ;;  %v5272_v36 = vld [vmem:[%s6592_s17 + $0x160] sm:$0xff]   ;;  %v5317_v12 = vld [vmem:[%s6592_s17 + $0x2f8] sm:$0xff]  }
 0xbde   :  { %v2809_v42 = vpack.c.bf16 %v2793_v40, %v2793_v40  ;;  %v2811_v43 = vpack.c.bf16 %v2795_v41, %v2795_v41  ;;  %v5273_v37 = vld [vmem:[%s6592_s17 + $0x1e0] sm:$0xff]   ;;  %v2272_v38 = vrot.slane %v6190_v14, %v2239_v31  ;;  %v5276_v41 = vld [vmem:[%s6592_s17 + $0x168] sm:$0xff]  }
 0xbdf   :  { %v5275_v40 = vld [vmem:[%s6592_s17 + $0x1a0] sm:$0xff]  }
 0xbe0   :  { %v6234_v52 = vpop.f32.mrb[48].mxu0  ;;  %v6236_v53 = vpop.f32.mrb[52].mxu1  ;;  %3887 = vmatprep.mubr.bf16.mxu0 %v2809_v42  ;;  %3927 = vmatprep.mubr.bf16.mxu1 %v2811_v43  ;;  %v5277_v42 = vld [vmem:[%s6592_s17 + $0x1e8] sm:$0xff]  }
 0xbe1   :  { %v2582_v54 = vpop.f32.mrb[49].mxu0  ;;  %v2623_v55 = vpop.f32.mrb[53].mxu1  ;;  %3888 = vmatmul.mubr.bf16.vlgmr.msra.gmra.mrb[60].mxu0 %v2808_v48  ;;  %3928 = vmatmul.mubr.bf16.vlgmr.msra.gmra.mrb[64].mxu1 %v2810_v49 }
 0xbe2   :  { %v2583_v56 = vadd.f32 %v2582_v54, %v2244_v44  ;;  %v2624_v57 = vadd.f32 %v2623_v55, %v2252_v45  ;;  %4841 = vmatpush3.bf16.msra.mxu0 %v5258_v46  ;;  %4863 = vmatpush3.bf16.msra.mxu1 %v5259_v47  ;;  %v2584_v58 = vpop.f32.mrb[50].mxu0  ;;  %v2625_v59 = vpop.f32.mrb[54].mxu1  ;;  %v5279_v54 = vld [vmem:[%s6592_s17 + $0x1a8] sm:$0xff]   ;;  %v2240_v55 = vrot.slane %v6202_v18, %v2239_v31  ;;  %v5298_v31 = vld [vmem:[%s6592_s17 + $0x210] sm:$0xff]  }
 0xbe3   :  { %v2585_v63 = vpop.f32.mrb[51].mxu0  ;;  %v2626_v2 = vpop.f32.mrb[55].mxu1  ;;  %4842 = vmatprep.subr.bf16.mxu0 %v5260_v50  ;;  %4864 = vmatprep.subr.bf16.mxu1 %v5261_v51  ;;  %v5278_v51 = vld [vmem:[%s6592_s17 + $0x128] sm:$0xff]   ;;  %v5280_v58 = vld [vmem:[%s6592_s17 + $0x170] sm:$0xff]  }
 0xbe4   :  { %v2797_v7 = vmax.f32 %v2583_v56, 0.0  ;;  %v2799_v8 = vmax.f32 %v2624_v57, 0.0  ;;  %v5281_v59 = vld [vmem:[%s6592_s17 + $0x1f0] sm:$0xff]   ;;  %v2581_v63 = vadd.f32 %v6234_v52, %v2240_v55  ;;  %v5286_v52 = vld [vmem:[%s6592_s17 + $0x138] sm:$0xff]   ;;  %v2276_v55 = vrot.slane %v6190_v14, %v2243_v34 }
 0xbe6   :  { %v2813_v3 = vpack.c.bf16 %v2797_v7, %v2797_v7  ;;  %v2815_v0 = vpack.c.bf16 %v2799_v8, %v2799_v8  ;;  %4843 = vmatpush3.bf16.msra.mxu0 %v5262_v60  ;;  %4865 = vmatpush3.bf16.msra.mxu1 %v5263_v61  ;;  %v2260_v60 = vrot.slane %v6190_v14, %v2227_v19  ;;  %v5283_v61 = vld [vmem:[%s6592_s17 + $0x1b0] sm:$0xff]   ;;  %v5284_v19 = vld [vmem:[%s6592_s17 + $0x178] sm:$0xff]   ;;  %v2796_v7 = vmax.f32 %v2581_v63, 0.0 }
 0xbe7   :  { %4844 = vmatprep.subr.bf16.mxu0 %v5264_v4  ;;  %4866 = vmatprep.subr.bf16.mxu1 %v5265_v6 }
 0xbe8   :  { %v2662_v22 = vpop.f32.mrb[52].mxu0  ;;  %v2703_v23 = vpop.f32.mrb[56].mxu1  ;;  %3967 = vmatprep.mubr.bf16.mxu0 %v2813_v3  ;;  %4007 = vmatprep.mubr.bf16.mxu1 %v2815_v0 }
 0xbe9   :  { %v6264_v24 = vadd.f32 %v2662_v22, %v2256_v9  ;;  %v6266_v25 = vadd.f32 %v2703_v23, %v2264_v10  ;;  %v2664_v26 = vpop.f32.mrb[53].mxu0  ;;  %v2705_v27 = vpop.f32.mrb[57].mxu1  ;;  %v5288_v9 = vld [vmem:[%s6592_s17 + $0x240] sm:$0xff]   ;;  %v5292_v23 = vld [vmem:[%s6592_s17 + $0x248] sm:$0xff]  }
 0xbea   :  { %4845 = vmatpush3.bf16.msra.mxu0 %v5266_v11  ;;  %4867 = vmatpush3.bf16.msra.mxu1 %v5267_v21  ;;  %v2666_v28 = vpop.f32.mrb[54].mxu0  ;;  %v2707_v62 = vpop.f32.mrb[58].mxu1  ;;  %v2665_v4 = vadd.f32 %v2664_v26, %v2260_v60  ;;  %v5289_v10 = vld [vmem:[%s6592_s17 + $0x2c0] sm:$0xff]   ;;  %v2812_v21 = vpack.c.bf16 %v2796_v7, %v2796_v7  ;;  %v5293_v26 = vld [vmem:[%s6592_s17 + $0x2c8] sm:$0xff]   ;;  %v5319_v60 = vld [vmem:[%s6592_s17 + $0x2b8] sm:$0xff]  }
 0xbeb   :  { %v2667_v32 = vpop.f32.mrb[55].mxu0  ;;  %v2708_v33 = vpop.f32.mrb[59].mxu1  ;;  %4846 = vmatprep.subr.bf16.mxu0 %v5268_v16  ;;  %4868 = vmatprep.subr.bf16.mxu1 %v5269_v17  ;;  %v5290_v11 = vld [vmem:[%s6592_s17 + $0x200] sm:$0xff]   ;;  %v5294_v28 = vld [vmem:[%s6592_s17 + $0x208] sm:$0xff]   ;;  %v5328_v7 = vld [vmem:[%s6592_s17 + $0x350] sm:$0xff]  }
 0xbec   :  { %v2801_v3 = vmax.f32 %v2665_v4, 0.0  ;;  %v5291_v17 = vld [vmem:[%s6592_s17 + $0x280] sm:$0xff]   ;;  %v5295_v62 = vld [vmem:[%s6592_s17 + $0x288] sm:$0xff]   ;;  %v5299_v32 = vld [vmem:[%s6592_s17 + $0x290] sm:$0xff]  }
 0xbed   :  { %v5300_v33 = vld [vmem:[%s6592_s17 + $0x258] sm:$0xff]   ;;  %v5325_v4 = vld [vmem:[%s6592_s17 + $0x3c8] sm:$0xff]  }
 0xbee   :  { %4847 = vmatpush3.bf16.msra.mxu0 %v5270_v29  ;;  %4869 = vmatpush3.bf16.msra.mxu1 %v5271_v30  ;;  %v2817_v22 = vpack.c.bf16 %v2801_v3, %v2801_v3  ;;  %v5296_v29 = vld [vmem:[%s6592_s17 + $0x250] sm:$0xff]   ;;  %v5332_v3 = vld [vmem:[%s6592_s17 + $0x358] sm:$0xff]  }
 0xbef   :  { %4848 = vmatprep.subr.bf16.mxu0 %v5272_v36  ;;  %4870 = vmatprep.subr.bf16.mxu1 %v5273_v37  ;;  %v5297_v30 = vld [vmem:[%s6592_s17 + $0x2d0] sm:$0xff]   ;;  %v5301_v36 = vld [vmem:[%s6592_s17 + $0x2d8] sm:$0xff]  }
 0xbf0   :  { %v2744_v43 = vpop.f32.mrb[56].mxu0  ;;  %v2785_v44 = vpop.f32.mrb[60].mxu1  ;;  %v5302_v37 = vld [vmem:[%s6592_s17 + $0x218] sm:$0xff]  }
 0xbf1   :  { %v6294_v45 = vadd.f32 %v2744_v43, %v2272_v38  ;;  %v6297_v46 = vadd.f32 %v2785_v44, %v6195_v15  ;;  %v6299_v47 = vpop.f32.mrb[57].mxu0  ;;  %v6301_v48 = vpop.f32.mrb[61].mxu1  ;;  %v2248_v15 = vrot.slane %v6202_v18, %v2247_v13  ;;  %v2268_v13 = vrot.slane %v6190_v14, %v2235_v20  ;;  %v5282_v18 = vld [vmem:[%s6592_s17 + $0x130] sm:$0xff]   ;;  %v5285_v20 = vld [vmem:[%s6592_s17 + $0x1f8] sm:$0xff]   ;;  %v5308_v43 = vld [vmem:[%s6592_s17 + $0x268] sm:$0xff]  }
 0xbf2   :  { %4849 = vmatpush3.bf16.msra.mxu0 %v5274_v39  ;;  %4871 = vmatpush3.bf16.msra.mxu1 %v5275_v40  ;;  %v2748_v49 = vpop.f32.mrb[58].mxu0  ;;  %v2789_v50 = vpop.f32.mrb[62].mxu1  ;;  %v5303_v38 = vld [vmem:[%s6592_s17 + $0x298] sm:$0xff]   ;;  %v5304_v39 = vld [vmem:[%s6592_s17 + $0x260] sm:$0xff]   ;;  %v5309_v44 = vld [vmem:[%s6592_s17 + $0x2e8] sm:$0xff]  }
 0xbf3   :  { %v2749_v56 = vpop.f32.mrb[59].mxu0  ;;  %v2790_v57 = vpop.f32.mrb[63].mxu1  ;;  %4850 = vmatprep.subr.bf16.mxu0 %v5276_v41  ;;  %4872 = vmatprep.subr.bf16.mxu1 %v5277_v42  ;;  %v2622_v2 = vadd.f32 %v6236_v53, %v2248_v15  ;;  %v2706_v6 = vadd.f32 %v2705_v27, %v2268_v13  ;;  %v5287_v53 = vld [vmem:[%s6592_s17 + $0x1b8] sm:$0xff]   ;;  %v5305_v40 = vld [vmem:[%s6592_s17 + $0x2e0] sm:$0xff]   ;;  %v5310_v49 = vld [vmem:[%s6592_s17 + $0x228] sm:$0xff]   ;;  %v2284_v15 = vrot.slane %v6190_v14, %v2251_v35 }
 0xbf4   :  { %v5306_v41 = vld [vmem:[%s6592_s17 + $0x220] sm:$0xff]   ;;  %v5311_v50 = vld [vmem:[%s6592_s17 + $0x2a8] sm:$0xff]   ;;  %v5314_v56 = vld [vmem:[%s6592_s17 + $0x230] sm:$0xff]   ;;  %v2747_v14 = vadd.f32 %v6299_v47, %v2276_v55  ;;  %v2802_v47 = vmax.f32 %v6266_v25, 0.0 }
 0xbf5   :  { %v2798_v8 = vmax.f32 %v2622_v2, 0.0  ;;  %v2803_v0 = vmax.f32 %v2706_v6, 0.0  ;;  %v5307_v42 = vld [vmem:[%s6592_s17 + $0x2a0] sm:$0xff]   ;;  %v5315_v57 = vld [vmem:[%s6592_s17 + $0x2b0] sm:$0xff]   ;;  %v2788_v34 = vadd.f32 %v6301_v48, %v2284_v15  ;;  %v5318_v35 = vld [vmem:[%s6592_s17 + $0x238] sm:$0xff]  }
 0xbf6   :  { %4851 = vmatpush3.bf16.msra.mxu0 %v5278_v51  ;;  %4873 = vmatpush3.bf16.msra.mxu1 %v5279_v54  ;;  %v5312_v51 = vld [vmem:[%s6592_s17 + $0x270] sm:$0xff]   ;;  %v5320_v13 = vld [vmem:[%s6592_s17 + $0x340] sm:$0xff]   ;;  %v2818_v25 = vpack.c.bf16 %v2802_v47, %v2802_v47 }
 0xbf7   :  { %4852 = vmatprep.subr.bf16.mxu0 %v5280_v58  ;;  %4874 = vmatprep.subr.bf16.mxu1 %v5281_v59  ;;  %v2814_v16 = vpack.c.bf16 %v2798_v8, %v2798_v8  ;;  %v2819_v27 = vpack.c.bf16 %v2803_v0, %v2803_v0  ;;  %v5313_v54 = vld [vmem:[%s6592_s17 + $0x2f0] sm:$0xff]   ;;  %v5316_v58 = vld [vmem:[%s6592_s17 + $0x278] sm:$0xff]   ;;  %v2800_v59 = vmax.f32 %v6264_v24, 0.0  ;;  %v5321_v48 = vld [vmem:[%s6592_s17 + $0x3c0] sm:$0xff]  }
 0xbf8   :  { %v5322_v24 = vld [vmem:[%s6592_s17 + $0x300] sm:$0xff]   ;;  %v5329_v8 = vld [vmem:[%s6592_s17 + $0x3d0] sm:$0xff]   ;;  %v5333_v0 = vld [vmem:[%s6592_s17 + $0x3d8] sm:$0xff]  }
 0xbf9   :  { %v2816_v63 = vpack.c.bf16 %v2800_v59, %v2800_v59  ;;  %v5323_v2 = vld [vmem:[%s6592_s17 + $0x380] sm:$0xff]  }
 0xbfa   :  { %4853 = vmatpush3.bf16.msra.mxu0 %v5282_v18  ;;  %4875 = vmatpush3.bf16.msra.mxu1 %v5283_v61  ;;  %v2805_v18 = vmax.f32 %v2747_v14, 0.0  ;;  %v2807_v61 = vmax.f32 %v2788_v34, 0.0 }
 0xbfb   :  { %4854 = vmatprep.subr.bf16.mxu0 %v5284_v19  ;;  %4876 = vmatprep.subr.bf16.mxu1 %v5285_v20  ;;  %v5324_v19 = vld [vmem:[%s6592_s17 + $0x348] sm:$0xff]  }
 0xbfc   :  { %v2821_v20 = vpack.c.bf16 %v2805_v18, %v2805_v18  ;;  %v2823_v6 = vpack.c.bf16 %v2807_v61, %v2807_v61 }
 0xbfe   :  { %4855 = vmatpush3.bf16.msra.mxu0 %v5286_v52  ;;  %4877 = vmatpush3.bf16.msra.mxu1 %v5287_v53  ;;  %v5326_v52 = vld [vmem:[%s6592_s17 + $0x308] sm:$0xff]  }
 0xbff   :  { %4884 = vmatprep.subr.bf16.mxu0 %v5288_v9  ;;  %4906 = vmatprep.subr.bf16.mxu1 %v5289_v10  ;;  %v5327_v53 = vld [vmem:[%s6592_s17 + $0x388] sm:$0xff]   ;;  %v5330_v9 = vld [vmem:[%s6592_s17 + $0x310] sm:$0xff]  }
 0xc00   :  { %v5331_v10 = vld [vmem:[%s6592_s17 + $0x390] sm:$0xff]  }
 0xc01   :  { %3968 = vmatmul.mubr.bf16.vlgmr.msra.gmra.mrb[64].mxu0 %v2812_v21  ;;  %4008 = vmatmul.mubr.bf16.vlgmr.msra.gmra.mrb[68].mxu1 %v2814_v16  ;;  %v5335_v21 = vld [vmem:[%s6592_s17 + $0x398] sm:$0xff]   ;;  %v5336_v16 = vld [vmem:[%s6592_s17 + $0x360] sm:$0xff]  }
 0xc02   :  { %4885 = vmatpush3.bf16.msra.mxu0 %v5290_v11  ;;  %4047 = vmatprep.mubr.bf16.mxu0 %v2817_v22  ;;  %v5334_v11 = vld [vmem:[%s6592_s17 + $0x318] sm:$0xff]   ;;  %v5338_v22 = vld [vmem:[%s6592_s17 + $0x320] sm:$0xff]  }
 0xc03   :  { %4907 = vmatpush3.bf16.msra.mxu1 %v5291_v17  ;;  %4087 = vmatprep.mubr.bf16.mxu1 %v2819_v27  ;;  %v5337_v17 = vld [vmem:[%s6592_s17 + $0x3e0] sm:$0xff]   ;;  %v5341_v27 = vld [vmem:[%s6592_s17 + $0x3e8] sm:$0xff]  }
 0xc04   :  { %4886 = vmatprep.subr.bf16.mxu0 %v5292_v23  ;;  %4908 = vmatprep.subr.bf16.mxu1 %v5293_v26  ;;  %v5339_v23 = vld [vmem:[%s6592_s17 + $0x3a0] sm:$0xff]   ;;  %v5340_v26 = vld [vmem:[%s6592_s17 + $0x368] sm:$0xff]  }
 0xc06   :  { %4887 = vmatpush3.bf16.msra.mxu0 %v5294_v28  ;;  %v5342_v28 = vld [vmem:[%s6592_s17 + $0x328] sm:$0xff]  }
 0xc07   :  { %4909 = vmatpush3.bf16.msra.mxu1 %v5295_v62  ;;  %4888 = vmatprep.subr.bf16.mxu0 %v5296_v29  ;;  %v5343_v62 = vld [vmem:[%s6592_s17 + $0x3a8] sm:$0xff]   ;;  %v5344_v29 = vld [vmem:[%s6592_s17 + $0x370] sm:$0xff]  }
 0xc08   :  { %4910 = vmatprep.subr.bf16.mxu1 %v5297_v30  ;;  %v5345_v30 = vld [vmem:[%s6592_s17 + $0x3f0] sm:$0xff]  }
 0xc0a   :  { %4889 = vmatpush3.bf16.msra.mxu0 %v5298_v31  ;;  %v5346_v31 = vld [vmem:[%s6592_s17 + $0x330] sm:$0xff]  }
 0xc0b   :  { %4911 = vmatpush3.bf16.msra.mxu1 %v5299_v32  ;;  %4890 = vmatprep.subr.bf16.mxu0 %v5300_v33  ;;  %v5347_v32 = vld [vmem:[%s6592_s17 + $0x3b0] sm:$0xff]   ;;  %v5348_v33 = vld [vmem:[%s6592_s17 + $0x378] sm:$0xff]  }
 0xc0c   :  { %4912 = vmatprep.subr.bf16.mxu1 %v5301_v36  ;;  %v5349_v36 = vld [vmem:[%s6592_s17 + $0x3f8] sm:$0xff]  }
 0xc0e   :  { %4891 = vmatpush3.bf16.msra.mxu0 %v5302_v37  ;;  %v5350_v37 = vld [vmem:[%s6592_s17 + $0x338] sm:$0xff]  }
 0xc0f   :  { %4913 = vmatpush3.bf16.msra.mxu1 %v5303_v38  ;;  %4892 = vmatprep.subr.bf16.mxu0 %v5304_v39  ;;  %v2804_v38 = vmax.f32 %v6294_v45, 0.0  ;;  %v5351_v39 = vld [vmem:[%s6592_s17 + $0x3b8] sm:$0xff]  }
 0xc10   :  { %4914 = vmatprep.subr.bf16.mxu1 %v5305_v40  ;;  %v2806_v40 = vmax.f32 %v6297_v46, 0.0 }
 0xc12   :  { %4893 = vmatpush3.bf16.msra.mxu0 %v5306_v41  ;;  %v2820_v41 = vpack.c.bf16 %v2804_v38, %v2804_v38  ;;  %v5353_v38 = vld [vmem:[%s6597_s21 + $0x8] sm:$0xff]  }
 0xc13   :  { %4915 = vmatpush3.bf16.msra.mxu1 %v5307_v42  ;;  %4894 = vmatprep.subr.bf16.mxu0 %v5308_v43  ;;  %v2822_v42 = vpack.c.bf16 %v2806_v40, %v2806_v40 }
 0xc14   :  { %4916 = vmatprep.subr.bf16.mxu1 %v5309_v44  ;;  %v4505_v44 = vld [vmem:[%s6596_s18] ss:$0 sm:$0xff] }
 0xc16   :  { %4895 = vmatpush3.bf16.msra.mxu0 %v5310_v49 }
 0xc17   :  { %4917 = vmatpush3.bf16.msra.mxu1 %v5311_v50  ;;  %4896 = vmatprep.subr.bf16.mxu0 %v5312_v51 }
 0xc18   :  { %4918 = vmatprep.subr.bf16.mxu1 %v5313_v54 }
 0xc1a   :  { %4897 = vmatpush3.bf16.msra.mxu0 %v5314_v56 }
 0xc1b   :  { %4919 = vmatpush3.bf16.msra.mxu1 %v5315_v57  ;;  %4898 = vmatprep.subr.bf16.mxu0 %v5316_v58 }
 0xc1c   :  { %4920 = vmatprep.subr.bf16.mxu1 %v5317_v12 }
 0xc1e   :  { %4899 = vmatpush3.bf16.msra.mxu0 %v5318_v35 }
 0xc1f   :  { %4921 = vmatpush3.bf16.msra.mxu1 %v5319_v60  ;;  %4928 = vmatprep.subr.bf16.mxu0 %v5320_v13 }
 0xc20   :  { %4950 = vmatprep.subr.bf16.mxu1 %v5321_v48 }
 0xc21   :  { %4048 = vmatmul.mubr.bf16.vlgmr.msra.gmra.mrb[68].mxu0 %v2816_v63 }
 0xc22   :  { %4088 = vmatmul.mubr.bf16.vlgmr.msra.gmra.mrb[72].mxu1 %v2818_v25  ;;  %4929 = vmatpush3.bf16.msra.mxu0 %v5322_v24 }
 0xc23   :  { %4127 = vmatprep.mubr.bf16.mxu0 %v2821_v20  ;;  %4951 = vmatpush3.bf16.msra.mxu1 %v5323_v2 }
 0xc24   :  { %4167 = vmatprep.mubr.bf16.mxu1 %v2823_v6  ;;  %4930 = vmatprep.subr.bf16.mxu0 %v5324_v19 }
 0xc25   :  { %4952 = vmatprep.subr.bf16.mxu1 %v5325_v4 }
 0xc26   :  { %4931 = vmatpush3.bf16.msra.mxu0 %v5326_v52 }
 0xc27   :  { %4953 = vmatpush3.bf16.msra.mxu1 %v5327_v53  ;;  %4932 = vmatprep.subr.bf16.mxu0 %v5328_v7 }
 0xc28   :  { %4954 = vmatprep.subr.bf16.mxu1 %v5329_v8 }
 0xc2a   :  { %4933 = vmatpush3.bf16.msra.mxu0 %v5330_v9 }
 0xc2b   :  { %4955 = vmatpush3.bf16.msra.mxu1 %v5331_v10  ;;  %4934 = vmatprep.subr.bf16.mxu0 %v5332_v3 }
 0xc2c   :  { %4956 = vmatprep.subr.bf16.mxu1 %v5333_v0 }
 0xc2e   :  { %4935 = vmatpush3.bf16.msra.mxu0 %v5334_v11 }
 0xc2f   :  { %4957 = vmatpush3.bf16.msra.mxu1 %v5335_v21  ;;  %4936 = vmatprep.subr.bf16.mxu0 %v5336_v16 }
 0xc30   :  { %4958 = vmatprep.subr.bf16.mxu1 %v5337_v17 }
 0xc32   :  { %4937 = vmatpush3.bf16.msra.mxu0 %v5338_v22 }
 0xc33   :  { %4959 = vmatpush3.bf16.msra.mxu1 %v5339_v23  ;;  %4938 = vmatprep.subr.bf16.mxu0 %v5340_v26 }
 0xc34   :  { %4960 = vmatprep.subr.bf16.mxu1 %v5341_v27 }
 0xc36   :  { %4939 = vmatpush3.bf16.msra.mxu0 %v5342_v28 }
 0xc37   :  { %4961 = vmatpush3.bf16.msra.mxu1 %v5343_v62  ;;  %4940 = vmatprep.subr.bf16.mxu0 %v5344_v29 }
 0xc38   :  { %4962 = vmatprep.subr.bf16.mxu1 %v5345_v30 }
 0xc3a   :  { %4941 = vmatpush3.bf16.msra.mxu0 %v5346_v31 }
 0xc3b   :  { %4963 = vmatpush3.bf16.msra.mxu1 %v5347_v32  ;;  %4942 = vmatprep.subr.bf16.mxu0 %v5348_v33 }
 0xc3c   :  { %4964 = vmatprep.subr.bf16.mxu1 %v5349_v36 }
 0xc3e   :  { %4943 = vmatpush3.bf16.msra.mxu0 %v5350_v37  ;;  %v5352_v37 = vld [vmem:[%s6597_s21] sm:$0xff]  }
 0xc3f   :  { %4965 = vmatpush3.bf16.msra.mxu1 %v5351_v39  ;;  %5105 = vmatprep.subr.bf16.mxu0 %v5375_v5 }
 0xc41   :  { %4128 = vmatmul.mubr.bf16.vlgmr.msra.gmra.mrb[72].mxu0 %v2820_v41 }
 0xc42   :  { %4168 = vmatmul.mubr.bf16.vlgmr.msra.gmra.mrb[76].mxu1 %v2822_v42  ;;  %5109 = vmatprep.mubr.msk.bf16.mxu0 %vm5376_vm3, %v5375_v5  ;;  %v4634_v42 = vld [vmem:[%s6598_s19] ss:$0 sm:$0xff] }
 0xc43   :  { %5106 = vmatpush3.bf16.msra.mxu0 %v5352_v37 }
 0xc44   :  { %5107 = vmatprep.subr.bf16.mxu0 %v5375_v5 }
 0xc47   :  { %5108 = vmatpush3.bf16.msra.mxu0 %v5353_v38 }
 0xcb4   :  { %v4812_v45 = vpop.f32.mrb[60].mxu0  ;;  %v4834_v43 = vpop.f32.mrb[64].mxu1 }
 0xcb5   :  { %v4813_v49 = vpop.f32.mrb[61].mxu0  ;;  %v4835_v46 = vpop.f32.mrb[65].mxu1 }
 0xcb6   :  { %v4814_v50 = vadd.f32 %v4813_v49, %v4812_v45  ;;  %v4836_v51 = vadd.f32 %v4835_v46, %v4834_v43  ;;  %v4815_v54 = vpop.f32.mrb[62].mxu0  ;;  %v4837_v55 = vpop.f32.mrb[66].mxu1  ;;  %v4635_v43 = vld [vmem:[%s6599_s20] ss:$0 sm:$0xff] }
 0xcb7   :  { %v4816_v15 = vpop.f32.mrb[63].mxu0  ;;  %v4838_v56 = vpop.f32.mrb[67].mxu1 }
 0xcb8   :  { %v3890_v57 = vadd.f32 %v4814_v50, %v4505_v44 }
 0xcba   :  { %v3930_v58 = vadd.f32 %v4836_v51, %v3890_v57 }
 0xcd4   :  { %v4856_v12 = vpop.f32.mrb[64].mxu0  ;;  %v4878_v14 = vpop.f32.mrb[68].mxu1 }
 0xcd5   :  { %v4857_v34 = vpop.f32.mrb[65].mxu0  ;;  %v4879_v35 = vpop.f32.mrb[69].mxu1 }
 0xcd6   :  { %v4858_v59 = vadd.f32 %v4857_v34, %v4856_v12  ;;  %v4880_v60 = vadd.f32 %v4879_v35, %v4878_v14  ;;  %v4859_v13 = vpop.f32.mrb[66].mxu0  ;;  %v4881_v47 = vpop.f32.mrb[70].mxu1 }
 0xcd7   :  { %v4860_v48 = vpop.f32.mrb[67].mxu0  ;;  %v4882_v18 = vpop.f32.mrb[71].mxu1 }
 0xcd8   :  { %v3970_v61 = vadd.f32 %v4858_v59, %v3930_v58 }
 0xcda   :  { %v4010_v24 = vadd.f32 %v4880_v60, %v3970_v61 }
 0xcf4   :  { %v4900_v63 = vpop.f32.mrb[68].mxu0 }
 0xcf5   :  { %v4922_v2 = vpop.f32.mrb[72].mxu1  ;;  %v4901_v25 = vpop.f32.mrb[69].mxu0 }
 0xcf6   :  { %v4902_v19 = vadd.f32 %v4901_v25, %v4900_v63  ;;  %v4923_v20 = vpop.f32.mrb[73].mxu1  ;;  %v4903_v4 = vpop.f32.mrb[70].mxu0 }
 0xcf7   :  { %v4924_v6 = vadd.f32 %v4923_v20, %v4922_v2  ;;  %v4925_v52 = vpop.f32.mrb[74].mxu1  ;;  %v4904_v53 = vpop.f32.mrb[71].mxu0  ;;  %v4636_v2 = vld [vmem:[%s6600_s22] ss:$0 sm:$0xff] }
 0xcf8   :  { %v4050_v7 = vadd.f32 %v4902_v19, %v4010_v24  ;;  %v4926_v8 = vpop.f32.mrb[75].mxu1 }
 0xcfa   :  { %v4090_v9 = vadd.f32 %v4924_v6, %v4050_v7 }
 0xd14   :  { %v4944_v10 = vpop.f32.mrb[72].mxu0 }
 0xd15   :  { %v4966_v3 = vpop.f32.mrb[76].mxu1  ;;  %v4945_v0 = vpop.f32.mrb[73].mxu0 }
 0xd16   :  { %v4946_v11 = vadd.f32 %v4945_v0, %v4944_v10  ;;  %v4967_v21 = vpop.f32.mrb[77].mxu1  ;;  %v4947_v16 = vpop.f32.mrb[74].mxu0 }
 0xd17   :  { %v4968_v17 = vadd.f32 %v4967_v21, %v4966_v3  ;;  %v4969_v22 = vpop.f32.mrb[78].mxu1  ;;  %v4948_v23 = vpop.f32.mrb[75].mxu0 }
 0xd18   :  { %v4130_v26 = vadd.f32 %v4946_v11, %v4090_v9  ;;  %v4970_v27 = vpop.f32.mrb[79].mxu1 }
 0xd1a   :  { %v4170_v28 = vadd.f32 %v4968_v17, %v4130_v26 }
 0xd1c   :  { %v4175_v62 = vadd.f32 %v4170_v28, %v6006_v1 }
 0xd1e   :  { %v4178_v29 = vsel %vm1084_vm8, %v4175_v62, 0.0 }
 0xd1f   :  { %4179 = vadd.xlane.f32.xlu0 %v4178_v29 }
 0xdac   :  { %v4180_v30 = vpop.xlane.xlu0 %4179 }
 0xdad   :  { %v4181_v31 = vmul.f32 0.03125, %v4180_v30 }
 0xdaf   :  { %v4182_v32 = vsub.f32 %v4175_v62, %v4181_v31 }
 0xdb1   :  { %v4183_v33 = vmul.f32 %v4182_v32, %v4182_v32 }
 0xdb3   :  { %v4184_v36 = vsel %vm1084_vm8, %v4183_v33, 0.0 }
 0xdb4   :  { %4185 = vadd.xlane.f32.xlu1 %v4184_v36 }
 0xe41   :  { %v4186_v1 = vpop.xlane.xlu1 %4185 }
 0xe42   :  { %v4187_v39 = vmul.f32 0.03125, %v4186_v1 }
 0xe44   :  { %v4188_v40 = vadd.f32 1e-05, %v4187_v39 }
 0xe46   :  { %5372 = vrsqrt.f32 %v4188_v40 }
 0xe50   :  { %v5373_v41 = vpop.eup %5372 }
 0xe51   :  { %v4190_v45 = vmul.f32 %v5373_v41, %v4182_v32 }
 0xe53   :  { %v4197_v44 = vmul.f32 %v4634_v42, %v4190_v45 }
 0xe55   :  { %v4204_v49 = vadd.f32 %v4635_v43, %v4197_v44 }
 0xe57   :  { %v4206_v46 = vcombine.high %v4204_v49, %v4204_v49  ;;  %v4209_v5 = vsel %vm4208_vm12, %v4204_v49, 0.0 }
 0xe58   :  { %v4210_v50 = vrot.slane %v4209_v5, 4 }
 0xe59   :  { %v4216_v51 = vsel %vm4208_vm12, %v4206_v46, 0.0 }
 0xe5a   :  { %v4211_v54 = vadd.f32 %v4210_v50, %v4209_v5  ;;  %v4217_v55 = vrot.slane %v4216_v51, 4 }
 0xe5c   :  { %v4212_v15 = vrot.slane %v4211_v54, 2  ;;  %v4218_v56 = vadd.f32 %v4217_v55, %v4216_v51 }
 0xe5e   :  { %v4213_v57 = vadd.f32 %v4212_v15, %v4211_v54  ;;  %v4219_v58 = vrot.slane %v4218_v56, 2 }
 0xe60   :  { %v4214_v12 = vrot.slane %v4213_v57, 1  ;;  %v4220_v14 = vadd.f32 %v4219_v58, %v4218_v56 }
 0xe62   :  { %v4215_v34 = vadd.f32 %v4214_v12, %v4213_v57  ;;  %v4221_v35 = vrot.slane %v4220_v14, 1 }
 0xe64   :  { %v4222_v59 = vadd.f32 %v4221_v35, %v4220_v14  ;;  %v4224_v60 = vmul.f32 0.25, %v4215_v34 }
 0xe66   :  { %v4225_v13 = vmul.f32 0.25, %v4222_v59  ;;  %v4226_v47 = vpack.c.bf16 %v4224_v60, %v4224_v60 }
 0xe68   :  { %v4227_v48 = vpack.c.bf16 %v4225_v13, %v4225_v13  ;;  %v4241_v18 = vunpack.c.l.b16 %v4226_v47 }
 0xe6a   :  { %v4242_v61 = vunpack.c.l.b16 %v4227_v48 }
 0xe6c   :  { %v4244_v24 = vsel %vm4243_vm13, %v4242_v61, %v4241_v18 }
 0xe6d   :  { %v4245_v63 = vpack.c.b16 %v4244_v24, %v4244_v24 }
 0xe6f   :  { %5110 = vmatmul.mubr.msk.bf16.vlgmr.msra.gmra.mrb[76].mxu0 %vm1084_vm8, %v4245_v63 }
 0xf42   :  { %v4295_v25 = vpop.f32.mrb[76].mxu0 }
 0xf43   :  { %v4296_v19 = vadd.f32 %v4636_v2, %v4295_v25  ;;  %v5111_v20 = vpop.f32.mrb[77].mxu0 }
 0xf44   :  { %v4298_v4 = vpop.f32.mrb[78].mxu0 }
 0xf45   :  { %4301 = vst [vmem:[%s6601_s23] sm:$0x3] %v4296_v19  ;;  %v5112_v6 = vpop.f32.mrb[79].mxu0 }

</bundles_post_ra>
